<compile_context>
chip_gen: v7x
topology: tpu7x:2x2x1
jax: 0.10.0
libtpu: 0.0.40
codegen_flags: <defaults>
</compile_context>

<pallas_src>
import jax
import jax.numpy as jnp
from jax.experimental import pallas as pl
from jax.experimental.pallas import tpu as pltpu

NEG_SLOPE = 0.2
P_DROP = 0.5


# --------------------------------------------------------------------------- #
# Kernel
# --------------------------------------------------------------------------- #
def _make_kernel(*, training: bool, quantized: bool):
    def kernel(*refs):
        idx = 0
        x_ref = refs[idx]; idx += 1                     # (TM, nz+att)  bf16
        if training:
            m1_ref = refs[idx]; m2_ref = refs[idx + 1]  # (TM, ngh), (TM, 1024)
            idx += 2
        if quantized:
            (w1q_ref, s1_ref, b1_ref,
             w2q_ref, s2_ref, b2_ref,
             w3q_ref, s3_ref, b3_ref) = refs[idx:idx + 9]
            idx += 9
            out_ref = refs[idx]; idx += 1
            w1s_ref, w2s_ref, w3s_ref = refs[idx:idx + 3]

            # One-time dequantization of the HBM int8 weights into VMEM bf16
            # scratch; scratch persists across all grid (batch-tile) steps.
            @pl.when(pl.program_id(0) == 0)
            def _dequant():
                w1s_ref[...] = (w1q_ref[...].astype(jnp.float32)
                                * s1_ref[...]).astype(w1s_ref.dtype)
                w2s_ref[...] = (w2q_ref[...].astype(jnp.float32)
                                * s2_ref[...]).astype(w2s_ref.dtype)
                w3s_ref[...] = (w3q_ref[...].astype(jnp.float32)
                                * s3_ref[...]).astype(w3s_ref.dtype)

            w1_ref, w2_ref, w3_ref = w1s_ref, w2s_ref, w3s_ref
        else:
            (w1_ref, b1_ref, w2_ref, b2_ref, w3_ref, b3_ref) = refs[idx:idx + 6]
            idx += 6
            out_ref = refs[idx]

        def lrelu(h):
            # slope in (0,1) -> max(h, slope*h) == LeakyReLU
            return jnp.maximum(h, NEG_SLOPE * h)

        # fc1 (single fused matmul on cat((noise, att), 1))
        h = jnp.dot(x_ref[...], w1_ref[...],
                    preferred_element_type=jnp.float32) + b1_ref[...]
        h = lrelu(h)
        if training:
            h = h * m1_ref[...].astype(jnp.float32)   # mask holds {0, 1/(1-p)}

        # fc2
        h = jnp.dot(h.astype(w2_ref.dtype), w2_ref[...],
                    preferred_element_type=jnp.float32) + b2_ref[...]
        h = lrelu(h)
        if training:
            h = h * m2_ref[...].astype(jnp.float32)

        # fc3 (no activation)
        out = jnp.dot(h.astype(w3_ref.dtype), w3_ref[...],
                      preferred_element_type=jnp.float32) + b3_ref[...]
        out_ref[...] = out.astype(out_ref.dtype)

    return kernel


# --------------------------------------------------------------------------- #
# Parameter init / prep
# --------------------------------------------------------------------------- #
def init_params(key, in_dim, ngh, h2, res_size):
    """weights_init: Linear.weight ~ N(0, 0.02), bias = 0 (PyTorch layout)."""
    k1, k2, k3 = jax.random.split(key, 3)
    return {
        "fc1_w": 0.02 * jax.random.normal(k1, (ngh, in_dim), jnp.float32),
        "fc1_b": jnp.zeros((ngh,), jnp.float32),
        "fc2_w": 0.02 * jax.random.normal(k2, (h2, ngh), jnp.float32),
        "fc2_b": jnp.zeros((h2,), jnp.float32),
        "fc3_w": 0.02 * jax.random.normal(k3, (res_size, h2), jnp.float32),
        "fc3_b": jnp.zeros((res_size,), jnp.float32),
    }


def _quantize_per_channel(wt):
    """wt: (K, N) f32 (already transposed). int8 with per-output-column scale."""
    s = jnp.maximum(jnp.max(jnp.abs(wt), axis=0, keepdims=True), 1e-8) / 127.0
    q = jnp.clip(jnp.round(wt / s), -127.0, 127.0).astype(jnp.int8)
    return q, s.astype(jnp.float32)


def prepare_params(params, compute_dtype=jnp.bfloat16, quantize=True):
    """One-time transpose (+ fuse fc1) (+ int8 weight-only quantization)."""
    w1t = params["fc1_w"].T        # (nz+att, ngh) - fused cat(noise, att) weight
    w2t = params["fc2_w"].T        # (ngh, 1024)
    w3t = params["fc3_w"].T        # (1024, res)
    prep = {
        "b1": params["fc1_b"].astype(jnp.float32)[None, :],
        "b2": params["fc2_b"].astype(jnp.float32)[None, :],
        "b3": params["fc3_b"].astype(jnp.float32)[None, :],
    }
    if quantize:
        prep["w1_q"], prep["s1"] = _quantize_per_channel(w1t)
        prep["w2_q"], prep["s2"] = _quantize_per_channel(w2t)
        prep["w3_q"], prep["s3"] = _quantize_per_channel(w3t)
    else:
        prep["w1"] = w1t.astype(compute_dtype)
        prep["w2"] = w2t.astype(compute_dtype)
        prep["w3"] = w3t.astype(compute_dtype)
    return prep


# --------------------------------------------------------------------------- #
# Forward wrapper
# --------------------------------------------------------------------------- #
def mlp_g_forward(noise, att, prep, *, training=False, rng_key=None, tm=None,
                  compute_dtype=jnp.bfloat16, out_dtype=jnp.float32):
    """noise: (B, nz) f32, att: (B, attSize) f32, prep: prepare_params output."""
    B = noise.shape[0]
    quantized = "w1_q" in prep
    w1 = prep["w1_q"] if quantized else prep["w1"]
    kin, ngh = w1.shape
    h2 = (prep["w2_q"] if quantized else prep["w2"]).shape[1]
    res = (prep["w3_q"] if quantized else prep["w3"]).shape[1]
    assert kin == noise.shape[1] + att.shape[1]

    # fc1 fusion: tiny bf16 concat in HBM instead of two padded-K MXU matmuls.
    x = jnp.concatenate([noise, att], axis=1).astype(compute_dtype)

    # Batch tile.
    if tm is None:
        tm = B if B <= 256 else 256
    tm = min(tm, B)
    if tm < B and tm % 8:
        tm = min(B, ((tm + 7) // 8) * 8)
    grid = (pl.cdiv(B, tm),)

    row = lambda i: (i, 0)      # batch-tiled arrays
    const = lambda i: (0, 0)    # VMEM-resident weights / biases / scales

    inputs = [x]
    in_specs = [pl.BlockSpec((tm, kin), row)]

    if training:
        if rng_key is None:
            rng_key = jax.random.PRNGKey(0)
        k1, k2 = jax.random.split(rng_key)
        keep_p = 1.0 - P_DROP
        scale = 1.0 / keep_p
        m1 = (jax.random.bernoulli(k1, keep_p, (B, ngh)).astype(jnp.float32)
              * scale).astype(compute_dtype)
        m2 = (jax.random.bernoulli(k2, keep_p, (B, h2)).astype(jnp.float32)
              * scale).astype(compute_dtype)
        inputs += [m1, m2]
        in_specs += [pl.BlockSpec((tm, ngh), row), pl.BlockSpec((tm, h2), row)]

    scratch_shapes = []
    if quantized:
        wnames = ("w1_q", "s1", "b1", "w2_q", "s2", "b2", "w3_q", "s3", "b3")
        scratch_shapes = [pltpu.VMEM(prep["w1_q"].shape, compute_dtype),
                          pltpu.VMEM(prep["w2_q"].shape, compute_dtype),
                          pltpu.VMEM(prep["w3_q"].shape, compute_dtype)]
    else:
        wnames = ("w1", "b1", "w2", "b2", "w3", "b3")
    for name in wnames:
        v = prep[name]
        inputs.append(v)
        in_specs.append(pl.BlockSpec(v.shape, const))

    out_specs = pl.BlockSpec((tm, res), row)

    # ---- VMEM budget (weights single-buffered; streamed tiles double-buffered)
    def nbytes(a):
        return int(a.size) * jnp.dtype(a.dtype).itemsize

    itemsize_c = jnp.dtype(compute_dtype).itemsize
    bytes_weights = sum(nbytes(prep[n]) for n in wnames)
    if quantized:  # bf16 dequant scratch copies
        bytes_weights += itemsize_c * (prep["w1_q"].size + prep["w2_q"].size
                                       + prep["w3_q"].size)
    bytes_stream = 2 * tm * kin * itemsize_c                         # x
    if training:
        bytes_stream += 2 * tm * (ngh + h2) * itemsize_c             # masks
    bytes_stream += 2 * tm * res * jnp.dtype(out_dtype).itemsize     # out
    bytes_hidden = tm * (ngh + h2 + res) * 4                         # f32 temps
    vmem_needed = bytes_weights + bytes_stream + bytes_hidden + (2 << 20)

    try:
        vmem_cap = int(pltpu.get_tpu_info().vmem_capacity_bytes)
    except Exception:
        vmem_cap = 64 << 20
    vmem_limit = int(min(int(0.8 * vmem_cap), max(16 << 20, vmem_needed)))

    # The quantized path relies on program_id==0 running first (dequant), so
    # the batch axis must be sequential ("arbitrary") in that case.
    sem = ("arbitrary",) if quantized else ("parallel",)

    out = pl.pallas_call(
        _make_kernel(training=training, quantized=quantized),
        out_shape=jax.ShapeDtypeStruct((B, res), out_dtype),
        grid_spec=pltpu.PrefetchScalarGridSpec(
            num_scalar_prefetch=0,
            grid=grid,
            in_specs=in_specs,
            out_specs=out_specs,
            scratch_shapes=scratch_shapes,
        ),
        compiler_params=pltpu.CompilerParams(
            dimension_semantics=sem,
            vmem_limit_bytes=vmem_limit,
        ),
    )(*inputs)
    return out


# --------------------------------------------------------------------------- #
# Self-test
# --------------------------------------------------------------------------- #
if __name__ == "__main__":
    # Small shapes consistent with the module (fc2 output fixed at 1024).
    B, NZ, ATT, NGH, H2, RES = 8, 16, 16, 128, 1024, 256

    key = jax.random.PRNGKey(0)
    kn, ka, kp = jax.random.split(key, 3)
    noise = jax.random.normal(kn, (B, NZ), jnp.float32)
    att = jax.random.normal(ka, (B, ATT), jnp.float32)
    params = init_params(kp, NZ + ATT, NGH, H2, RES)
    prep = prepare_params(params, quantize=True)

    # Reference uses the SAME dequantized weights / bf16 matmul / f32 accumulate.
    w1_ref = (prep["w1_q"].astype(jnp.float32) * prep["s1"]).astype(jnp.bfloat16)
    w2_ref = (prep["w2_q"].astype(jnp.float32) * prep["s2"]).astype(jnp.bfloat16)
    w3_ref = (prep["w3_q"].astype(jnp.float32) * prep["s3"]).astype(jnp.bfloat16)
    x_ref = jnp.concatenate([noise, att], axis=1).astype(jnp.bfloat16)

    def ref_forward(m1=None, m2=None):
        h = jnp.dot(x_ref, w1_ref, preferred_element_type=jnp.float32) + prep["b1"]
        h = jnp.maximum(h, NEG_SLOPE * h)
        if m1 is not None:
            h = h * m1.astype(jnp.float32)
        h = jnp.dot(h.astype(jnp.bfloat16), w2_ref,
                    preferred_element_type=jnp.float32) + prep["b2"]
        h = jnp.maximum(h, NEG_SLOPE * h)
        if m2 is not None:
            h = h * m2.astype(jnp.float32)
        return jnp.dot(h.astype(jnp.bfloat16), w3_ref,
                       preferred_element_type=jnp.float32) + prep["b3"]

    # ---- Eval mode (dropout = identity, matches PyTorch .eval()).
    out = mlp_g_forward(noise, att, prep, training=False)
    jax.block_until_ready(out)
    ref = ref_forward()
    assert out.shape == (B, RES)
    assert jnp.allclose(out, ref, rtol=2e-2, atol=1e-3), \
        float(jnp.max(jnp.abs(out - ref)))

    # ---- Training mode: host-generated inverted-dropout masks.
    rng = jax.random.PRNGKey(7)
    out_tr = mlp_g_forward(noise, att, prep, training=True, rng_key=rng)
    jax.block_until_ready(out_tr)
    k1, k2 = jax.random.split(rng)
    keep_p = 1.0 - P_DROP
    m1 = (jax.random.bernoulli(k1, keep_p, (B, NGH)).astype(jnp.float32)
          * (1.0 / keep_p)).astype(jnp.bfloat16)
    m2 = (jax.random.bernoulli(k2, keep_p, (B, H2)).astype(jnp.float32)
          * (1.0 / keep_p)).astype(jnp.bfloat16)
    ref_tr = ref_forward(m1, m2)
    assert out_tr.shape == (B, RES)
    assert bool(jnp.all(jnp.isfinite(out_tr)))
    assert jnp.allclose(out_tr, ref_tr, rtol=2e-2, atol=1e-3), \
        float(jnp.max(jnp.abs(out_tr - ref_tr)))

    print("KERNEL_OK")
</pallas_src>

<mosaic_0001>
module attributes {stable_mosaic.version = 11 : i64} {
  func.func @kernel(%arg0: i32, %arg1: memref<8x32xbf16, #tpu.memory_space<vmem>>, %arg2: memref<32x128xi8, #tpu.memory_space<vmem>>, %arg3: memref<1x128xf32, #tpu.memory_space<vmem>>, %arg4: memref<1x128xf32, #tpu.memory_space<vmem>>, %arg5: memref<128x1024xi8, #tpu.memory_space<vmem>>, %arg6: memref<1x1024xf32, #tpu.memory_space<vmem>>, %arg7: memref<1x1024xf32, #tpu.memory_space<vmem>>, %arg8: memref<1024x256xi8, #tpu.memory_space<vmem>>, %arg9: memref<1x256xf32, #tpu.memory_space<vmem>>, %arg10: memref<1x256xf32, #tpu.memory_space<vmem>>, %arg11: memref<8x256xf32, #tpu.memory_space<vmem>>, %arg12: memref<32x128xbf16, #tpu.memory_space<vmem>>, %arg13: memref<128x1024xbf16, #tpu.memory_space<vmem>>, %arg14: memref<1024x256xbf16, #tpu.memory_space<vmem>>) attributes {dimension_semantics = [#tpu.dimension_semantics<arbitrary>], iteration_bounds = array<i64: 1>, scalar_prefetch = 0 : i64, scratch_operands = 3 : i64, tpu.core_type = #tpu.core_type<tc>, window_params = [{transform_indices = @transform_0, window_bounds = array<i64: 8, 32>}, {pipeline_mode = #tpu.pipeline_mode<synchronous>, transform_indices = @transform_1, window_bounds = array<i64: 32, 128>}, {pipeline_mode = #tpu.pipeline_mode<synchronous>, transform_indices = @transform_2, window_bounds = array<i64: 1, 128>}, {pipeline_mode = #tpu.pipeline_mode<synchronous>, transform_indices = @transform_3, window_bounds = array<i64: 1, 128>}, {pipeline_mode = #tpu.pipeline_mode<synchronous>, transform_indices = @transform_4, window_bounds = array<i64: 128, 1024>}, {pipeline_mode = #tpu.pipeline_mode<synchronous>, transform_indices = @transform_5, window_bounds = array<i64: 1, 1024>}, {pipeline_mode = #tpu.pipeline_mode<synchronous>, transform_indices = @transform_6, window_bounds = array<i64: 1, 1024>}, {pipeline_mode = #tpu.pipeline_mode<synchronous>, transform_indices = @transform_7, window_bounds = array<i64: 1024, 256>}, {pipeline_mode = #tpu.pipeline_mode<synchronous>, transform_indices = @transform_8, window_bounds = array<i64: 1, 256>}, {pipeline_mode = #tpu.pipeline_mode<synchronous>, transform_indices = @transform_9, window_bounds = array<i64: 1, 256>}, {transform_indices = @transform_10, window_bounds = array<i64: 8, 256>}]} {
    %c0_i32 = arith.constant 0 : i32
    %0 = arith.cmpi eq, %arg0, %c0_i32 : i32
    %1 = arith.extui %0 : i1 to i32
    %c0_i32_0 = arith.constant 0 : i32
    %2 = arith.cmpi ne, %1, %c0_i32_0 : i32
    scf.if %2 {
      %c0_20 = arith.constant 0 : index
      %c0_21 = arith.constant 0 : index
      %28 = vector.load %arg2[%c0_20, %c0_21] : memref<32x128xi8, #tpu.memory_space<vmem>>, vector<32x128xi8>
      %29 = arith.sitofp %28 : vector<32x128xi8> to vector<32x128xf32>
      %c0_22 = arith.constant 0 : index
      %c0_23 = arith.constant 0 : index
      %30 = vector.load %arg3[%c0_22, %c0_23] : memref<1x128xf32, #tpu.memory_space<vmem>>, vector<1x128xf32>
      %31 = vector.broadcast %30 : vector<1x128xf32> to vector<32x128xf32>
      %32 = arith.mulf %29, %31 : vector<32x128xf32>
      %33 = arith.truncf %32 : vector<32x128xf32> to vector<32x128xbf16>
      %c0_24 = arith.constant 0 : index
      %c0_25 = arith.constant 0 : index
      %34 = vector.load %arg12[%c0_24, %c0_25] : memref<32x128xbf16, #tpu.memory_space<vmem>>, vector<32x128xbf16>
      tpu.vector_store %arg12[%c0_24, %c0_25], %33 {strides = array<i32>} : memref<32x128xbf16, #tpu.memory_space<vmem>>, vector<32x128xbf16>,
      %c0_26 = arith.constant 0 : index
      %c0_27 = arith.constant 0 : index
      %35 = vector.load %arg5[%c0_26, %c0_27] : memref<128x1024xi8, #tpu.memory_space<vmem>>, vector<128x1024xi8>
      %36 = arith.sitofp %35 : vector<128x1024xi8> to vector<128x1024xf32>
      %c0_28 = arith.constant 0 : index
      %c0_29 = arith.constant 0 : index
      %37 = vector.load %arg6[%c0_28, %c0_29] : memref<1x1024xf32, #tpu.memory_space<vmem>>, vector<1x1024xf32>
      %38 = vector.broadcast %37 : vector<1x1024xf32> to vector<128x1024xf32>
      %39 = arith.mulf %36, %38 : vector<128x1024xf32>
      %40 = arith.truncf %39 : vector<128x1024xf32> to vector<128x1024xbf16>
      %c0_30 = arith.constant 0 : index
      %c0_31 = arith.constant 0 : index
      %41 = vector.load %arg13[%c0_30, %c0_31] : memref<128x1024xbf16, #tpu.memory_space<vmem>>, vector<128x1024xbf16>
      tpu.vector_store %arg13[%c0_30, %c0_31], %40 {strides = array<i32>} : memref<128x1024xbf16, #tpu.memory_space<vmem>>, vector<128x1024xbf16>,
      %c0_32 = arith.constant 0 : index
      %c0_33 = arith.constant 0 : index
      %42 = vector.load %arg8[%c0_32, %c0_33] : memref<1024x256xi8, #tpu.memory_space<vmem>>, vector<1024x256xi8>
      %43 = arith.sitofp %42 : vector<1024x256xi8> to vector<1024x256xf32>
      %c0_34 = arith.constant 0 : index
      %c0_35 = arith.constant 0 : index
      %44 = vector.load %arg9[%c0_34, %c0_35] : memref<1x256xf32, #tpu.memory_space<vmem>>, vector<1x256xf32>
      %45 = vector.broadcast %44 : vector<1x256xf32> to vector<1024x256xf32>
      %46 = arith.mulf %43, %45 : vector<1024x256xf32>
      %47 = arith.truncf %46 : vector<1024x256xf32> to vector<1024x256xbf16>
      %c0_36 = arith.constant 0 : index
      %c0_37 = arith.constant 0 : index
      %48 = vector.load %arg14[%c0_36, %c0_37] : memref<1024x256xbf16, #tpu.memory_space<vmem>>, vector<1024x256xbf16>
      tpu.vector_store %arg14[%c0_36, %c0_37], %47 {strides = array<i32>} : memref<1024x256xbf16, #tpu.memory_space<vmem>>, vector<1024x256xbf16>,
    } else {
    }
    %c0 = arith.constant 0 : index
    %c0_1 = arith.constant 0 : index
    %3 = vector.load %arg1[%c0, %c0_1] : memref<8x32xbf16, #tpu.memory_space<vmem>>, vector<8x32xbf16>
    %c0_2 = arith.constant 0 : index
    %c0_3 = arith.constant 0 : index
    %4 = vector.load %arg12[%c0_2, %c0_3] : memref<32x128xbf16, #tpu.memory_space<vmem>>, vector<32x128xbf16>
    %cst = arith.constant dense<0.000000e+00> : vector<8x128xf32>
    %5 = tpu.matmul %3, %4, %cst {dimension_numbers = #tpu.dot_dimension_numbers<[1], [0], [0], [1], [0, 0, 1, 1], [], []>} : vector<8x32xbf16>, vector<32x128xbf16>, vector<8x128xf32> -> vector<8x128xf32>
    %c0_4 = arith.constant 0 : index
    %c0_5 = arith.constant 0 : index
    %6 = vector.load %arg4[%c0_4, %c0_5] : memref<1x128xf32, #tpu.memory_space<vmem>>, vector<1x128xf32>
    %7 = vector.broadcast %6 : vector<1x128xf32> to vector<8x128xf32>
    %8 = arith.addf %5, %7 : vector<8x128xf32>
    %cst_6 = arith.constant 2.000000e-01 : f32
    %9 = vector.broadcast %cst_6 : f32 to vector<8x128xf32>
    %10 = arith.mulf %9, %8 : vector<8x128xf32>
    %11 = arith.maximumf %8, %10 : vector<8x128xf32>
    %12 = arith.truncf %11 : vector<8x128xf32> to vector<8x128xbf16>
    %c0_7 = arith.constant 0 : index
    %c0_8 = arith.constant 0 : index
    %13 = vector.load %arg13[%c0_7, %c0_8] : memref<128x1024xbf16, #tpu.memory_space<vmem>>, vector<128x1024xbf16>
    %cst_9 = arith.constant dense<0.000000e+00> : vector<8x1024xf32>
    %14 = tpu.matmul %12, %13, %cst_9 {dimension_numbers = #tpu.dot_dimension_numbers<[1], [0], [0], [1], [0, 0, 1, 1], [], []>} : vector<8x128xbf16>, vector<128x1024xbf16>, vector<8x1024xf32> -> vector<8x1024xf32>
    %c0_10 = arith.constant 0 : index
    %c0_11 = arith.constant 0 : index
    %15 = vector.load %arg7[%c0_10, %c0_11] : memref<1x1024xf32, #tpu.memory_space<vmem>>, vector<1x1024xf32>
    %16 = vector.broadcast %15 : vector<1x1024xf32> to vector<8x1024xf32>
    %17 = arith.addf %14, %16 : vector<8x1024xf32>
    %cst_12 = arith.constant 2.000000e-01 : f32
    %18 = vector.broadcast %cst_12 : f32 to vector<8x1024xf32>
    %19 = arith.mulf %18, %17 : vector<8x1024xf32>
    %20 = arith.maximumf %17, %19 : vector<8x1024xf32>
    %21 = arith.truncf %20 : vector<8x1024xf32> to vector<8x1024xbf16>
    %c0_13 = arith.constant 0 : index
    %c0_14 = arith.constant 0 : index
    %22 = vector.load %arg14[%c0_13, %c0_14] : memref<1024x256xbf16, #tpu.memory_space<vmem>>, vector<1024x256xbf16>
    %cst_15 = arith.constant dense<0.000000e+00> : vector<8x256xf32>
    %23 = tpu.matmul %21, %22, %cst_15 {dimension_numbers = #tpu.dot_dimension_numbers<[1], [0], [0], [1], [0, 0, 1, 1], [], []>} : vector<8x1024xbf16>, vector<1024x256xbf16>, vector<8x256xf32> -> vector<8x256xf32>
    %c0_16 = arith.constant 0 : index
    %c0_17 = arith.constant 0 : index
    %24 = vector.load %arg10[%c0_16, %c0_17] : memref<1x256xf32, #tpu.memory_space<vmem>>, vector<1x256xf32>
    %25 = vector.broadcast %24 : vector<1x256xf32> to vector<8x256xf32>
    %26 = arith.addf %23, %25 : vector<8x256xf32>
    %c0_18 = arith.constant 0 : index
    %c0_19 = arith.constant 0 : index
    %27 = vector.load %arg11[%c0_18, %c0_19] : memref<8x256xf32, #tpu.memory_space<vmem>>, vector<8x256xf32>
    tpu.vector_store %arg11[%c0_18, %c0_19], %26 {strides = array<i32>} : memref<8x256xf32, #tpu.memory_space<vmem>>, vector<8x256xf32>,
    return
  }
  func.func @transform_0(%arg0: i32) -> (i32, i32) {
    %c0_i32 = arith.constant 0 : i32
    %c0_i32_0 = arith.constant 0 : i32
    return %arg0, %c0_i32 : i32, i32
  }
  func.func @transform_1(%arg0: i32) -> (i32, i32) {
    %c0_i32 = arith.constant 0 : i32
    %c0_i32_0 = arith.constant 0 : i32
    %c0_i32_1 = arith.constant 0 : i32
    return %c0_i32, %c0_i32_0 : i32, i32
  }
  func.func @transform_2(%arg0: i32) -> (i32, i32) {
    %c0_i32 = arith.constant 0 : i32
    %c0_i32_0 = arith.constant 0 : i32
    %c0_i32_1 = arith.constant 0 : i32
    return %c0_i32, %c0_i32_0 : i32, i32
  }
  func.func @transform_3(%arg0: i32) -> (i32, i32) {
    %c0_i32 = arith.constant 0 : i32
    %c0_i32_0 = arith.constant 0 : i32
    %c0_i32_1 = arith.constant 0 : i32
    return %c0_i32, %c0_i32_0 : i32, i32
  }
  func.func @transform_4(%arg0: i32) -> (i32, i32) {
    %c0_i32 = arith.constant 0 : i32
    %c0_i32_0 = arith.constant 0 : i32
    %c0_i32_1 = arith.constant 0 : i32
    return %c0_i32, %c0_i32_0 : i32, i32
  }
  func.func @transform_5(%arg0: i32) -> (i32, i32) {
    %c0_i32 = arith.constant 0 : i32
    %c0_i32_0 = arith.constant 0 : i32
    %c0_i32_1 = arith.constant 0 : i32
    return %c0_i32, %c0_i32_0 : i32, i32
  }
  func.func @transform_6(%arg0: i32) -> (i32, i32) {
    %c0_i32 = arith.constant 0 : i32
    %c0_i32_0 = arith.constant 0 : i32
    %c0_i32_1 = arith.constant 0 : i32
    return %c0_i32, %c0_i32_0 : i32, i32
  }
  func.func @transform_7(%arg0: i32) -> (i32, i32) {
    %c0_i32 = arith.constant 0 : i32
    %c0_i32_0 = arith.constant 0 : i32
    %c0_i32_1 = arith.constant 0 : i32
    return %c0_i32, %c0_i32_0 : i32, i32
  }
  func.func @transform_8(%arg0: i32) -> (i32, i32) {
    %c0_i32 = arith.constant 0 : i32
    %c0_i32_0 = arith.constant 0 : i32
    %c0_i32_1 = arith.constant 0 : i32
    return %c0_i32, %c0_i32_0 : i32, i32
  }
  func.func @transform_9(%arg0: i32) -> (i32, i32) {
    %c0_i32 = arith.constant 0 : i32
    %c0_i32_0 = arith.constant 0 : i32
    %c0_i32_1 = arith.constant 0 : i32
    return %c0_i32, %c0_i32_0 : i32, i32
  }
  func.func @transform_10(%arg0: i32) -> (i32, i32) {
    %c0_i32 = arith.constant 0 : i32
    %c0_i32_0 = arith.constant 0 : i32
    return %arg0, %c0_i32 : i32, i32
  }
}

</mosaic_0001>

<bundles_post_ra>
// kernel: tpu_custom_call.1
= control target key start
LH: loop header
LB: loop body
LE: loop exit
PB: predicated region body
PF: predicated region fallthrough
CT: control target
= control target key end

     0   :  { %15 = vsyncpa [#allocation6], 0  ;;  %s4292_s0 = inlined_call_operand.hbm [shape: bf16[8,32], index: 0, kind: input, shape index: {}]   ;;  %s4293_s1 = inlined_call_operand.hbm [shape: s8[32,128], index: 1, kind: input, shape index: {}]   ;;  %s4294_s2 = inlined_call_operand.hbm [shape: f32[1,128], index: 2, kind: input, shape index: {}]   ;;  %s4295_s3 = inlined_call_operand.hbm [shape: f32[1,128], index: 3, kind: input, shape index: {}]   ;;  %s4296_s4 = inlined_call_operand.hbm [shape: s8[128,1024], index: 4, kind: input, shape index: {}]   ;;  %s4297_s5 = inlined_call_operand.vmem [shape: f32[1,1024], index: 5, kind: input, shape index: {}]   ;;  %s4298_s6 = inlined_call_operand.vmem [shape: f32[1,1024], index: 6, kind: input, shape index: {}]   ;;  %s4299_s7 = inlined_call_operand.hbm [shape: s8[1024,256], index: 7, kind: input, shape index: {}]   ;;  %s4300_s8 = inlined_call_operand.vmem [shape: f32[1,256], index: 8, kind: input, shape index: {}]   ;;  %s4301_s9 = inlined_call_operand.vmem [shape: f32[1,256], index: 9, kind: input, shape index: {}]   ;;  %s4302_s10 = inlined_call_operand.hbm [shape: f32[8,256], index: 10, kind: output, shape index: {}]  }
   0x1   :  { %16 = vsyncpa [#allocation9], 0 }
   0x2   :  { %17 = vsyncpa [#allocation12], 0 }
   0x3   :  { %18 = vsyncpa [#allocation15], 0 }
   0x4   :  { %19 = vsyncpa [#allocation7], 0  ;;  %s2705_s13 = smov [#allocation8]   ;;  %s2706_s15 = smov [#allocation11]  }
   0x5   :  { %s36_s14 = sshll.u32 %s2705_s13, 4  ;;  %s56_s16 = sshll.u32 %s2706_s15, 4  ;;  %s37_s14 = int_to_ptr.vmem [resolvable:$true] %s36_s14  ;;  %s57_s16 = int_to_ptr.vmem [resolvable:$true] %s56_s16 }
   0x6   :  { %s2541_s19 = scalar_lea.hbm %s4293_s1, 128 }
   0x7   :  { %p2542_p0 = scmp.ne.s32.totalorder %s4293_s1, %s2541_s19  ;;  %p2545_p1 = scmp.lt.u32.totalorder %s2541_s19, %s4293_s1 }
   0x9   :  { %p2547_p2 = pnand %p2545_p1, %p2542_p0 }
   0xb   :  { %2550 = shalt.err (!%p2547_p2)
}
   0xc   :  { %s2551_s24 = scalar_lea.vmem %s37_s14, 128  ;;  %p2556_p4 = scmp.lt.s32.totalorder %s37_s14, %s37_s14 }
   0xd   :  { %p2552_p3 = scmp.ne.s32.totalorder %s37_s14, %s2551_s24  ;;  %p2557_p5 = scmp.lt.s32.totalorder %s2551_s24, %s2551_s24 }
   0xf   :  { %p2558_p6 = por %p2557_p5, %p2556_p4 }
  0x11   :  { %p2559_p7 = pnand %p2558_p6, %p2552_p3 }
  0x13   :  { %2562 = shalt.err (!%p2559_p7)
}
  0x14   :  { %39 = dma.hbm_to_vmem [thread:$0]  %s4293_s1, 128, %s37_s14, [#allocation9]  }
  0x15   :  { %s2563_s29 = scalar_lea.hbm %s4295_s3, 16 }
  0x16   :  { %p2564_p8 = scmp.ne.s32.totalorder %s4295_s3, %s2563_s29  ;;  %p2567_p9 = scmp.lt.u32.totalorder %s2563_s29, %s4295_s3 }
  0x18   :  { %p2569_p10 = pnand %p2567_p9, %p2564_p8 }
  0x1a   :  { %2572 = shalt.err (!%p2569_p10)
}
  0x1b   :  { %s2573_s15 = scalar_lea.vmem %s57_s16, 16  ;;  %s2577_s17 = scalar_lea.vmem %s57_s16, 32 }
  0x1c   :  { %p2574_p11 = scmp.ne.s32.totalorder %s57_s16, %s2573_s15  ;;  %p2578_p12 = scmp.lt.s32.totalorder %s57_s16, %s57_s16 }
  0x1d   :  { %p2579_p13 = scmp.lt.s32.totalorder %s2577_s17, %s2573_s15 }
  0x1f   :  { %p2580_p0 = por %p2579_p13, %p2578_p12 }
  0x21   :  { %p2581_p1 = pnand %p2580_p0, %p2574_p11 }
  0x23   :  { %2584 = shalt.err (!%p2581_p1)
}
  0x24   :  { %59 = dma.hbm_to_vmem [thread:$0]  %s4295_s3, 16, %s57_s16, [#allocation12]  }
  0x25   :  { %s2707_s18 = smov [#allocation5]   ;;  %s2708_s20 = smov [#allocation10]  }
  0x26   :  { %s26_s19 = sshll.u32 %s2707_s18, 4  ;;  %s46_s21 = sshll.u32 %s2708_s20, 4  ;;  %s27_s19 = int_to_ptr.vmem [resolvable:$true] %s26_s19  ;;  %s47_s21 = int_to_ptr.vmem [resolvable:$true] %s46_s21 }
  0x27   :  { %s2585_s24 = scalar_lea.hbm %s4292_s0, 64 }
  0x28   :  { %p2586_p2 = scmp.ne.s32.totalorder %s4292_s0, %s2585_s24  ;;  %p2589_p3 = scmp.lt.u32.totalorder %s2585_s24, %s4292_s0 }
  0x2a   :  { %p2591_p4 = pnand %p2589_p3, %p2586_p2 }
  0x2c   :  { %2594 = shalt.err (!%p2591_p4)
}
  0x2d   :  { %s2595_s3 = scalar_lea.vmem %s27_s19, 64  ;;  %p2600_p6 = scmp.lt.s32.totalorder %s27_s19, %s27_s19 }
  0x2e   :  { %p2596_p5 = scmp.ne.s32.totalorder %s27_s19, %s2595_s3  ;;  %p2601_p7 = scmp.lt.s32.totalorder %s2595_s3, %s2595_s3 }
  0x30   :  { %p2602_p8 = por %p2601_p7, %p2600_p6 }
  0x32   :  { %p2603_p9 = pnand %p2602_p8, %p2596_p5 }
  0x34   :  { %2606 = shalt.err (!%p2603_p9)
}
  0x35   :  { %29 = dma.hbm_to_vmem [thread:$0]  %s4292_s0, 64, %s27_s19, [#allocation6]  }
  0x36   :  { %s2607_s12 = scalar_lea.hbm %s4294_s2, 16 }
  0x37   :  { %p2608_p10 = scmp.ne.s32.totalorder %s4294_s2, %s2607_s12  ;;  %p2611_p11 = scmp.lt.u32.totalorder %s2607_s12, %s4294_s2 }
  0x39   :  { %p2613_p12 = pnand %p2611_p11, %p2608_p10 }
  0x3b   :  { %2616 = shalt.err (!%p2613_p12)
}
  0x3c   :  { %s2617_s14 = scalar_lea.vmem %s47_s21, 16  ;;  %s2621_s18 = scalar_lea.vmem %s47_s21, 32 }
  0x3d   :  { %p2618_p13 = scmp.ne.s32.totalorder %s47_s21, %s2617_s14  ;;  %p2622_p0 = scmp.lt.s32.totalorder %s47_s21, %s47_s21 }
  0x3e   :  { %p2623_p1 = scmp.lt.s32.totalorder %s2621_s18, %s2617_s14 }
  0x40   :  { %p2624_p2 = por %p2623_p1, %p2622_p0 }
  0x42   :  { %p2625_p3 = pnand %p2624_p2, %p2618_p13 }
  0x44   :  { %2628 = shalt.err (!%p2625_p3)
}
  0x45   :  { %49 = dma.hbm_to_vmem [thread:$0]  %s4294_s2, 16, %s47_s21, [#allocation9]  }
  0x46   :  { %s2709_s20 = smov [#allocation13]   ;;  %s2629_s25 = scalar_lea.hbm %s4296_s4, 4096 }
  0x47   :  { %s65_s22 = sshll.u32 %s2709_s20, 4  ;;  %p2630_p4 = scmp.ne.s32.totalorder %s4296_s4, %s2629_s25  ;;  %s66_s22 = int_to_ptr.vmem [resolvable:$true] %s65_s22 }
  0x48   :  { %p2633_p5 = scmp.lt.u32.totalorder %s2629_s25, %s4296_s4 }
  0x4a   :  { %p2635_p6 = pnand %p2633_p5, %p2630_p4 }
  0x4c   :  { %2638 = shalt.err (!%p2635_p6)
}
  0x4d   :  { %s2639_s16 = scalar_lea.vmem %s66_s22, 4096  ;;  %p2644_p8 = scmp.lt.s32.totalorder %s66_s22, %s66_s22 }
  0x4e   :  { %p2640_p7 = scmp.ne.s32.totalorder %s66_s22, %s2639_s16  ;;  %p2645_p9 = scmp.lt.s32.totalorder %s2639_s16, %s2639_s16 }
  0x50   :  { %p2646_p10 = por %p2645_p9, %p2644_p8 }
  0x52   :  { %p2647_p11 = pnand %p2646_p10, %p2640_p7 }
  0x54   :  { %2650 = shalt.err (!%p2647_p11)
}
  0x55   :  { %s2710_s2 = smov 1024   ;;  %s2711_s21 = smov 64  }
  0x56   :  { %71 = dma.hbm_to_vmem [thread:$0]  %s4296_s4, 4096, %s66_s22, [#allocation12], %s2710_s2, %s2710_s2, %s2711_s21  }
  0x57   :  { %s2712_s11 = smov [#allocation14]   ;;  %s2651_s17 = scalar_lea.hbm %s4299_s7, 8192 }
  0x58   :  { %s81_s12 = sshll.u32 %s2712_s11, 4  ;;  %p2652_p12 = scmp.ne.s32.totalorder %s4299_s7, %s2651_s17  ;;  %s82_s12 = int_to_ptr.vmem [resolvable:$true] %s81_s12 }
  0x59   :  { %p2655_p13 = scmp.lt.u32.totalorder %s2651_s17, %s4299_s7 }
  0x5b   :  { %p2657_p0 = pnand %p2655_p13, %p2652_p12 }
  0x5d   :  { %2660 = shalt.err (!%p2657_p0)
}
  0x5e   :  { %s2661_s19 = scalar_lea.vmem %s82_s12, 8192  ;;  %p2666_p2 = scmp.lt.s32.totalorder %s82_s12, %s82_s12 }
  0x5f   :  { %p2662_p1 = scmp.ne.s32.totalorder %s82_s12, %s2661_s19  ;;  %p2667_p3 = scmp.lt.s32.totalorder %s2661_s19, %s2661_s19 }
  0x61   :  { %p2668_p4 = por %p2667_p3, %p2666_p2 }
  0x63   :  { %p2669_p5 = pnand %p2668_p4, %p2662_p1 }
  0x65   :  { %2672 = shalt.err (!%p2669_p5)
}
  0x66   :  { %s2713_s4 = smov 256   ;;  %s2714_s20 = smov 16  }
  0x67   :  { %87 = dma.hbm_to_vmem [thread:$0]  %s4299_s7, 8192, %s82_s12, [#allocation15], %s2713_s4, %s2713_s4, %s2714_s20  }
  0x68   :  { %2695 = dma.done.wait [#allocation6], 64  }
  0x69   :  { %2696 = vsyncadd [#allocation6], 4294967232 }
  0x6a   :  { %2697 = dma.done.wait [#allocation9], 144  }
  0x6b   :  { %2698 = vsyncadd [#allocation9], 4294967152 }
  0x6c   :  { %2699 = dma.done.wait [#allocation12], 4112  }
  0x6d   :  { %2700 = vsyncadd [#allocation12], 4294963184 }
  0x6e   :  { %2701 = dma.done.wait [#allocation15], 8192  }
  0x6f   :  { %2702 = vsyncadd [#allocation15], 4294959104  ;;  %v429_v0 = vlaneseq  ;;  %v2715_v1 = vmov 0.0   ;;  %vm2716_vm0 = vmmov 0   ;;  %v115_v4 = vld [vmem:[#allocation8] sm:$0xff]  ;;  %v140_v11 = vld [vmem:[#allocation13 + $0x8] sm:$0xff] }
  0x70   :  { %2506 = vmatprep.subr.bf16.mxu0 %v2715_v1  ;;  %2510 = vmatprep.mubr.msk.bf16.mxu0 %vm2716_vm0, %v2715_v1  ;;  %v116_v7 = vunpack.c.0.s8 %v115_v4  ;;  %v117_v8 = vunpack.c.1.s8 %v115_v4  ;;  %v118_v9 = vunpack.c.2.s8 %v115_v4  ;;  %v119_v10 = vunpack.c.3.s8 %v115_v4  ;;  %v2858_v12 = vld [vmem:[%s4297_s5] sm:$0xff]  ;;  %v2500_v13 = vld [vmem:[#allocation10] ss:$0 sm:$0xff]  ;;  %v141_v36 = vld [vmem:[#allocation13 + $0x10] sm:$0xff]  ;;  %s2718_s16 = smov [#allocation16]  }
  0x71   :  { %v2846_v2 = vshrl.u32 %v429_v0, 7  ;;  %v172_v14 = vunpack.c.0.s8 %v140_v11  ;;  %v180_v15 = vunpack.c.1.s8 %v140_v11  ;;  %v142_v17 = vld [vmem:[#allocation13 + $0x18] sm:$0xff]  ;;  %v139_v27 = vld [vmem:[#allocation13] sm:$0xff]  ;;  %vm1835_vm1 = vcmask 261120   ;;  %v1825_v60 = vld [vmem:[#allocation5] sm:$0xf] }
  0x72   :  { %v120_v19 = vcvt.s32.f32 %v116_v7  ;;  %v121_v20 = vcvt.s32.f32 %v117_v8  ;;  %v122_v21 = vcvt.s32.f32 %v118_v9  ;;  %v123_v22 = vcvt.s32.f32 %v119_v10  ;;  %s2488_s2 = sshll.u32 %s2718_s16, 4  ;;  %s2489_s2 = int_to_ptr.vmem [resolvable:$true] %s2488_s2 }
  0x73   :  { %4348 = vst [vmem:[#allocation22_spill] sm:$0xff] %v2846_v2  ;;  %v2849_v3 = vsub.s32 1, %v2846_v2  ;;  %v4307_v5 = vsub.s32 3, %v2846_v2  ;;  %v2853_v6 = vsub.s32 0, %v2846_v2  ;;  %v4308_v18 = vsub.s32 2, %v2846_v2  ;;  %s2673_s21 = scalar_lea.vmem %s2489_s2, 256  ;;  %p2678_p7 = scmp.lt.s32.totalorder %s2489_s2, %s2489_s2 }
  0x74   :  { %v300_v23 = vcvt.s32.f32 %v172_v14  ;;  %v308_v24 = vcvt.s32.f32 %v180_v15  ;;  %v174_v25 = vunpack.c.0.s8 %v142_v17  ;;  %v182_v26 = vunpack.c.1.s8 %v142_v17  ;;  %v148_v14 = vld [vmem:[#allocation13 + $0x48] sm:$0xff]  ;;  %p2674_p6 = scmp.ne.s32.totalorder %s2489_s2, %s2673_s21  ;;  %p2679_p8 = scmp.lt.s32.totalorder %s2673_s21, %s2673_s21 }
  0x75   :  { %4349 = vst [vmem:[#allocation23_spill] sm:$0xff] %v2849_v3  ;;  %4350 = vst [vmem:[#allocation24_spill] sm:$0xff] %v2853_v6  ;;  %v2862_v16 = vrot.slane %v2858_v12, %v2849_v3  ;;  %v131_v28 = vmul.f32 %v2500_v13, %v120_v19  ;;  %v132_v29 = vmul.f32 %v2500_v13, %v121_v20  ;;  %v171_v39 = vunpack.c.0.s8 %v139_v27 }
  0x76   :  { %v133_v30 = vmul.f32 %v2500_v13, %v122_v21  ;;  %v134_v31 = vmul.f32 %v2500_v13, %v123_v22  ;;  %v302_v34 = vcvt.s32.f32 %v174_v25  ;;  %v310_v35 = vcvt.s32.f32 %v182_v26  ;;  %v150_v21 = vld [vmem:[#allocation13 + $0x58] sm:$0xff]  ;;  %p2680_p9 = por %p2679_p8, %p2678_p7 }
  0x77   :  { %v470_v32 = vmul.f32 %v2862_v16, %v300_v23  ;;  %v478_v33 = vmul.f32 %v2862_v16, %v308_v24  ;;  %v135_v37 = vpack.c.bf16 %v132_v29, %v131_v28  ;;  %v2870_v38 = vrot.slane %v2858_v12, %v4307_v5 }
  0x78   :  { %v136_v40 = vpack.c.bf16 %v134_v31, %v133_v30  ;;  %v179_v42 = vunpack.c.1.s8 %v139_v27  ;;  %v2874_v43 = vrot.slane %v2858_v12, %v2853_v6  ;;  %v299_v46 = vcvt.s32.f32 %v171_v39  ;;  %v147_v30 = vld [vmem:[#allocation13 + $0x40] sm:$0xff]  ;;  %p2681_p10 = pnand %p2680_p9, %p2674_p6 }
  0x79   :  { %v598_v41 = vpack.c.bf16 %v478_v33, %v470_v32  ;;  %2507 = vmatpush3.bf16.msra.mxu0 %v135_v37  ;;  %v472_v44 = vmul.f32 %v2870_v38, %v302_v34  ;;  %v480_v45 = vmul.f32 %v2870_v38, %v310_v35  ;;  %v173_v47 = vunpack.c.0.s8 %v141_v36 }
  0x7a   :  { %2508 = vmatprep.subr.bf16.mxu0 %v2715_v1  ;;  %v307_v48 = vcvt.s32.f32 %v179_v42  ;;  %v181_v49 = vunpack.c.1.s8 %v141_v36  ;;  %v2881_v50 = vrot.slane %v2858_v12, %v4308_v18  ;;  %v188_v51 = vunpack.c.2.s8 %v140_v11 }
  0x7b   :  { %1988 = vmatprep.subr.bf16.mxu1 %v598_v41  ;;  %v600_v52 = vpack.c.bf16 %v480_v45, %v472_v44  ;;  %v469_v53 = vmul.f32 %v2874_v43, %v299_v46  ;;  %v301_v54 = vcvt.s32.f32 %v173_v47  ;;  %v196_v55 = vunpack.c.3.s8 %v140_v11 }
  0x7c   :  { %v477_v56 = vmul.f32 %v2874_v43, %v307_v48  ;;  %v309_v57 = vcvt.s32.f32 %v181_v49  ;;  %v316_v58 = vcvt.s32.f32 %v188_v51  ;;  %v190_v59 = vunpack.c.2.s8 %v142_v17 }
  0x7d   :  { %2509 = vmatpush3.bf16.msra.mxu0 %v136_v40  ;;  %v471_v61 = vmul.f32 %v2881_v50, %v301_v54  ;;  %v324_v62 = vcvt.s32.f32 %v196_v55  ;;  %v198_v63 = vunpack.c.3.s8 %v142_v17  ;;  %v187_v0 = vunpack.c.2.s8 %v139_v27  ;;  %v149_v40 = vld [vmem:[#allocation13 + $0x50] sm:$0xff] }
  0x7e   :  { %2029 = vmatprep.subr.bf16.mxu0 %v600_v52  ;;  %v597_v1 = vpack.c.bf16 %v477_v56, %v469_v53  ;;  %v479_v4 = vmul.f32 %v2881_v50, %v309_v57  ;;  %v486_v7 = vmul.f32 %v2862_v16, %v316_v58  ;;  %v318_v8 = vcvt.s32.f32 %v190_v59 }
  0x7f   :  { %v494_v9 = vmul.f32 %v2862_v16, %v324_v62  ;;  %v326_v10 = vcvt.s32.f32 %v198_v63  ;;  %v195_v11 = vunpack.c.3.s8 %v139_v27  ;;  %v315_v13 = vcvt.s32.f32 %v187_v0 }
  0x80   :  { %2511 = vmatmul.mubr.msk.bf16.vlgmr.msra.gmra.mrb[0].mxu0 %vm1835_vm1, %v1825_v60  ;;  %1989 = vmatpush1.bf16.msra.mxu1 %v597_v1  ;;  %v599_v15 = vpack.c.bf16 %v479_v4, %v471_v61  ;;  %v488_v17 = vmul.f32 %v2870_v38, %v318_v8  ;;  %v189_v19 = vunpack.c.2.s8 %v141_v36  ;;  %v197_v20 = vunpack.c.3.s8 %v141_v36 }
  0x81   :  { %v606_v22 = vpack.c.bf16 %v494_v9, %v486_v7  ;;  %v496_v23 = vmul.f32 %v2870_v38, %v326_v10  ;;  %v323_v24 = vcvt.s32.f32 %v195_v11  ;;  %v485_v25 = vmul.f32 %v2874_v43, %v315_v13 }
  0x82   :  { %2030 = vmatpush1.bf16.msra.mxu0 %v599_v15  ;;  %v317_v26 = vcvt.s32.f32 %v189_v19  ;;  %v325_v27 = vcvt.s32.f32 %v197_v20  ;;  %v204_v28 = vunpack.c.0.s8 %v148_v14  ;;  %v212_v29 = vunpack.c.1.s8 %v148_v14 }
  0x83   :  { %1990 = vmatprep.subr.bf16.mxu1 %v606_v22  ;;  %v608_v31 = vpack.c.bf16 %v496_v23, %v488_v17  ;;  %v493_v32 = vmul.f32 %v2874_v43, %v323_v24  ;;  %v206_v33 = vunpack.c.0.s8 %v150_v21  ;;  %v214_v34 = vunpack.c.1.s8 %v150_v21  ;;  %v156_v23 = vld [vmem:[#allocation13 + $0x88] sm:$0xff] }
  0x84   :  { %v487_v35 = vmul.f32 %v2881_v50, %v317_v26  ;;  %v495_v36 = vmul.f32 %v2881_v50, %v325_v27  ;;  %v332_v37 = vcvt.s32.f32 %v204_v28  ;;  %v340_v39 = vcvt.s32.f32 %v212_v29 }
  0x85   :  { %2031 = vmatprep.subr.bf16.mxu0 %v608_v31  ;;  %v605_v41 = vpack.c.bf16 %v493_v32, %v485_v25  ;;  %v334_v42 = vcvt.s32.f32 %v206_v33  ;;  %v342_v44 = vcvt.s32.f32 %v214_v34  ;;  %v203_v45 = vunpack.c.0.s8 %v147_v30 }
  0x86   :  { %v607_v46 = vpack.c.bf16 %v495_v36, %v487_v35  ;;  %v502_v47 = vmul.f32 %v2862_v16, %v332_v37  ;;  %v510_v48 = vmul.f32 %v2862_v16, %v340_v39  ;;  %v211_v49 = vunpack.c.1.s8 %v147_v30  ;;  %v155_v36 = vld [vmem:[#allocation13 + $0x80] sm:$0xff] }
  0x87   :  { %1991 = vmatpush1.bf16.msra.mxu1 %v605_v41  ;;  %v504_v51 = vmul.f32 %v2870_v38, %v334_v42  ;;  %v512_v52 = vmul.f32 %v2870_v38, %v342_v44  ;;  %v331_v53 = vcvt.s32.f32 %v203_v45  ;;  %v205_v54 = vunpack.c.0.s8 %v149_v40 }
  0x88   :  { %2032 = vmatpush1.bf16.msra.mxu0 %v607_v46  ;;  %v614_v55 = vpack.c.bf16 %v510_v48, %v502_v47  ;;  %v339_v56 = vcvt.s32.f32 %v211_v49  ;;  %v213_v57 = vunpack.c.1.s8 %v149_v40  ;;  %v220_v58 = vunpack.c.2.s8 %v148_v14  ;;  %v157_v47 = vld [vmem:[#allocation13 + $0x90] sm:$0xff] }
  0x89   :  { %v616_v59 = vpack.c.bf16 %v512_v52, %v504_v51  ;;  %v501_v60 = vmul.f32 %v2874_v43, %v331_v53  ;;  %v333_v61 = vcvt.s32.f32 %v205_v54  ;;  %v228_v62 = vunpack.c.3.s8 %v148_v14 }
  0x8a   :  { %1992 = vmatprep.subr.bf16.mxu1 %v614_v55  ;;  %v509_v63 = vmul.f32 %v2874_v43, %v339_v56  ;;  %v341_v0 = vcvt.s32.f32 %v213_v57  ;;  %v348_v1 = vcvt.s32.f32 %v220_v58  ;;  %v222_v4 = vunpack.c.2.s8 %v150_v21 }
  0x8b   :  { %2033 = vmatprep.subr.bf16.mxu0 %v616_v59  ;;  %v503_v7 = vmul.f32 %v2881_v50, %v333_v61  ;;  %v356_v8 = vcvt.s32.f32 %v228_v62  ;;  %v230_v9 = vunpack.c.3.s8 %v150_v21  ;;  %v219_v10 = vunpack.c.2.s8 %v147_v30  ;;  %v158_v21 = vld [vmem:[#allocation13 + $0x98] sm:$0xff] }
  0x8c   :  { %v613_v11 = vpack.c.bf16 %v509_v63, %v501_v60  ;;  %v511_v13 = vmul.f32 %v2881_v50, %v341_v0  ;;  %v518_v15 = vmul.f32 %v2862_v16, %v348_v1  ;;  %v350_v17 = vcvt.s32.f32 %v222_v4 }
  0x8d   :  { %v526_v14 = vmul.f32 %v2862_v16, %v356_v8  ;;  %v358_v19 = vcvt.s32.f32 %v230_v9  ;;  %v227_v20 = vunpack.c.3.s8 %v147_v30  ;;  %v347_v22 = vcvt.s32.f32 %v219_v10 }
  0x8e   :  { %1993 = vmatpush1.bf16.msra.mxu1 %v613_v11  ;;  %v615_v24 = vpack.c.bf16 %v511_v13, %v503_v7  ;;  %v520_v25 = vmul.f32 %v2870_v38, %v350_v17  ;;  %v221_v26 = vunpack.c.2.s8 %v149_v40  ;;  %v229_v27 = vunpack.c.3.s8 %v149_v40 }
  0x8f   :  { %v622_v28 = vpack.c.bf16 %v526_v14, %v518_v15  ;;  %v528_v29 = vmul.f32 %v2870_v38, %v358_v19  ;;  %v355_v31 = vcvt.s32.f32 %v227_v20  ;;  %v517_v32 = vmul.f32 %v2874_v43, %v347_v22 }
  0x90   :  { %2034 = vmatpush1.bf16.msra.mxu0 %v615_v24  ;;  %v349_v33 = vcvt.s32.f32 %v221_v26  ;;  %v357_v34 = vcvt.s32.f32 %v229_v27  ;;  %v236_v35 = vunpack.c.0.s8 %v156_v23  ;;  %v244_v30 = vunpack.c.1.s8 %v156_v23 }
  0x91   :  { %1994 = vmatprep.subr.bf16.mxu1 %v622_v28  ;;  %v624_v37 = vpack.c.bf16 %v528_v29, %v520_v25  ;;  %v525_v39 = vmul.f32 %v2874_v43, %v355_v31  ;;  %v238_v41 = vunpack.c.0.s8 %v158_v21  ;;  %v246_v42 = vunpack.c.1.s8 %v158_v21 }
  0x92   :  { %v519_v40 = vmul.f32 %v2881_v50, %v349_v33  ;;  %v527_v44 = vmul.f32 %v2881_v50, %v357_v34  ;;  %v364_v45 = vcvt.s32.f32 %v236_v35  ;;  %v372_v46 = vcvt.s32.f32 %v244_v30 }
  0x93   :  { %2035 = vmatprep.subr.bf16.mxu0 %v624_v37  ;;  %v621_v48 = vpack.c.bf16 %v525_v39, %v517_v32  ;;  %v366_v49 = vcvt.s32.f32 %v238_v41  ;;  %v374_v51 = vcvt.s32.f32 %v246_v42  ;;  %v235_v52 = vunpack.c.0.s8 %v155_v36 }
  0x94   :  { %v623_v53 = vpack.c.bf16 %v527_v44, %v519_v40  ;;  %v534_v54 = vmul.f32 %v2862_v16, %v364_v45  ;;  %v542_v55 = vmul.f32 %v2862_v16, %v372_v46  ;;  %v243_v56 = vunpack.c.1.s8 %v155_v36  ;;  %v164_v46 = vld [vmem:[#allocation13 + $0xc8] sm:$0xff] }
  0x95   :  { %1995 = vmatpush1.bf16.msra.mxu1 %v621_v48  ;;  %v536_v57 = vmul.f32 %v2870_v38, %v366_v49  ;;  %v544_v58 = vmul.f32 %v2870_v38, %v374_v51  ;;  %v363_v59 = vcvt.s32.f32 %v235_v52  ;;  %v237_v60 = vunpack.c.0.s8 %v157_v47 }
  0x96   :  { %2036 = vmatpush1.bf16.msra.mxu0 %v623_v53  ;;  %v630_v61 = vpack.c.bf16 %v542_v55, %v534_v54  ;;  %v371_v62 = vcvt.s32.f32 %v243_v56  ;;  %v245_v63 = vunpack.c.1.s8 %v157_v47  ;;  %v252_v0 = vunpack.c.2.s8 %v156_v23  ;;  %v163_v53 = vld [vmem:[#allocation13 + $0xc0] sm:$0xff]  ;;  %v165_v54 = vld [vmem:[#allocation13 + $0xd0] sm:$0xff] }
  0x97   :  { %v632_v1 = vpack.c.bf16 %v544_v58, %v536_v57  ;;  %v533_v4 = vmul.f32 %v2874_v43, %v363_v59  ;;  %v365_v7 = vcvt.s32.f32 %v237_v60  ;;  %v260_v8 = vunpack.c.3.s8 %v156_v23 }
  0x98   :  { %1996 = vmatprep.subr.bf16.mxu1 %v630_v61  ;;  %v541_v9 = vmul.f32 %v2874_v43, %v371_v62  ;;  %v373_v10 = vcvt.s32.f32 %v245_v63  ;;  %v380_v11 = vcvt.s32.f32 %v252_v0  ;;  %v254_v13 = vunpack.c.2.s8 %v158_v21 }
  0x99   :  { %2037 = vmatprep.subr.bf16.mxu0 %v632_v1  ;;  %v535_v15 = vmul.f32 %v2881_v50, %v365_v7  ;;  %v388_v17 = vcvt.s32.f32 %v260_v8  ;;  %v262_v14 = vunpack.c.3.s8 %v158_v21  ;;  %v251_v19 = vunpack.c.2.s8 %v155_v36 }
  0x9a   :  { %v629_v20 = vpack.c.bf16 %v541_v9, %v533_v4  ;;  %v543_v22 = vmul.f32 %v2881_v50, %v373_v10  ;;  %v550_v24 = vmul.f32 %v2862_v16, %v380_v11  ;;  %v382_v25 = vcvt.s32.f32 %v254_v13 }
  0x9b   :  { %v558_v23 = vmul.f32 %v2862_v16, %v388_v17  ;;  %v390_v26 = vcvt.s32.f32 %v262_v14  ;;  %v259_v27 = vunpack.c.3.s8 %v155_v36  ;;  %v379_v28 = vcvt.s32.f32 %v251_v19 }
  0x9c   :  { %1997 = vmatpush1.bf16.msra.mxu1 %v629_v20  ;;  %v631_v29 = vpack.c.bf16 %v543_v22, %v535_v15  ;;  %v552_v31 = vmul.f32 %v2870_v38, %v382_v25  ;;  %v253_v32 = vunpack.c.2.s8 %v157_v47  ;;  %v261_v33 = vunpack.c.3.s8 %v157_v47  ;;  %v166_v47 = vld [vmem:[#allocation13 + $0xd8] sm:$0xff] }
  0x9d   :  { %v638_v34 = vpack.c.bf16 %v558_v23, %v550_v24  ;;  %v560_v21 = vmul.f32 %v2870_v38, %v390_v26  ;;  %v387_v35 = vcvt.s32.f32 %v259_v27  ;;  %v549_v30 = vmul.f32 %v2874_v43, %v379_v28 }
  0x9e   :  { %2038 = vmatpush1.bf16.msra.mxu0 %v631_v29  ;;  %v381_v37 = vcvt.s32.f32 %v253_v32  ;;  %v389_v39 = vcvt.s32.f32 %v261_v33  ;;  %v268_v48 = vunpack.c.0.s8 %v164_v46  ;;  %v276_v49 = vunpack.c.1.s8 %v164_v46 }
  0x9f   :  { %1998 = vmatprep.subr.bf16.mxu1 %v638_v34  ;;  %v640_v41 = vpack.c.bf16 %v560_v21, %v552_v31  ;;  %v557_v36 = vmul.f32 %v2874_v43, %v387_v35  ;;  %v270_v51 = vunpack.c.0.s8 %v166_v47  ;;  %v278_v52 = vunpack.c.1.s8 %v166_v47  ;;  %v144_v35 = vld [vmem:[#allocation13 + $0x28] sm:$0xff] }
  0xa0   :  { %v551_v42 = vmul.f32 %v2881_v50, %v381_v37  ;;  %v559_v40 = vmul.f32 %v2881_v50, %v389_v39  ;;  %v267_v55 = vunpack.c.0.s8 %v163_v53  ;;  %v275_v56 = vunpack.c.1.s8 %v163_v53 }
  0xa1   :  { %2039 = vmatprep.subr.bf16.mxu0 %v640_v41  ;;  %v637_v44 = vpack.c.bf16 %v557_v36, %v549_v30  ;;  %v269_v57 = vunpack.c.0.s8 %v165_v54  ;;  %v277_v58 = vunpack.c.1.s8 %v165_v54  ;;  %v396_v59 = vcvt.s32.f32 %v268_v48 }
  0xa2   :  { %v639_v45 = vpack.c.bf16 %v559_v40, %v551_v42  ;;  %v404_v60 = vcvt.s32.f32 %v276_v49  ;;  %v398_v61 = vcvt.s32.f32 %v270_v51  ;;  %v406_v62 = vcvt.s32.f32 %v278_v52 }
  0xa3   :  { %1999 = vmatpush1.bf16.msra.mxu1 %v637_v44  ;;  %v395_v63 = vcvt.s32.f32 %v267_v55  ;;  %v403_v0 = vcvt.s32.f32 %v275_v56  ;;  %v397_v1 = vcvt.s32.f32 %v269_v57  ;;  %v405_v4 = vcvt.s32.f32 %v277_v58 }
  0xa4   :  { %2040 = vmatpush1.bf16.msra.mxu0 %v639_v45  ;;  %v566_v7 = vmul.f32 %v2862_v16, %v396_v59  ;;  %v574_v8 = vmul.f32 %v2862_v16, %v404_v60  ;;  %v568_v9 = vmul.f32 %v2870_v38, %v398_v61  ;;  %v576_v10 = vmul.f32 %v2870_v38, %v406_v62  ;;  %v146_v45 = vld [vmem:[#allocation13 + $0x38] sm:$0xff] }
  0xa5   :  { %v565_v11 = vmul.f32 %v2874_v43, %v395_v63  ;;  %v573_v13 = vmul.f32 %v2874_v43, %v403_v0  ;;  %v567_v15 = vmul.f32 %v2881_v50, %v397_v1  ;;  %v575_v17 = vmul.f32 %v2881_v50, %v405_v4 }
  0xa6   :  { %v646_v14 = vpack.c.bf16 %v574_v8, %v566_v7  ;;  %v648_v19 = vpack.c.bf16 %v576_v10, %v568_v9  ;;  %v284_v20 = vunpack.c.2.s8 %v164_v46  ;;  %v292_v22 = vunpack.c.3.s8 %v164_v46 }
  0xa7   :  { %v645_v24 = vpack.c.bf16 %v573_v13, %v565_v11  ;;  %v647_v25 = vpack.c.bf16 %v575_v17, %v567_v15  ;;  %v286_v23 = vunpack.c.2.s8 %v166_v47  ;;  %v294_v26 = vunpack.c.3.s8 %v166_v47 }
  0xa8   :  { %2000 = vmatprep.subr.bf16.mxu1 %v646_v14  ;;  %2041 = vmatprep.subr.bf16.mxu0 %v648_v19  ;;  %v412_v27 = vcvt.s32.f32 %v284_v20  ;;  %v420_v28 = vcvt.s32.f32 %v292_v22  ;;  %v283_v29 = vunpack.c.2.s8 %v163_v53  ;;  %v291_v31 = vunpack.c.3.s8 %v163_v53 }
  0xa9   :  { %2001 = vmatpush1.bf16.msra.mxu1 %v645_v24  ;;  %2042 = vmatpush1.bf16.msra.mxu0 %v647_v25  ;;  %v414_v32 = vcvt.s32.f32 %v286_v23  ;;  %v422_v33 = vcvt.s32.f32 %v294_v26  ;;  %v285_v34 = vunpack.c.2.s8 %v165_v54  ;;  %v293_v21 = vunpack.c.3.s8 %v165_v54 }
  0xaa   :  { %v582_v30 = vmul.f32 %v2862_v16, %v412_v27  ;;  %v590_v37 = vmul.f32 %v2862_v16, %v420_v28  ;;  %v411_v39 = vcvt.s32.f32 %v283_v29  ;;  %v419_v41 = vcvt.s32.f32 %v291_v31  ;;  %v143_v28 = vld [vmem:[#allocation13 + $0x20] sm:$0xff]  ;;  %v145_v29 = vld [vmem:[#allocation13 + $0x30] sm:$0xff] }
  0xab   :  { %v584_v36 = vmul.f32 %v2870_v38, %v414_v32  ;;  %v592_v42 = vmul.f32 %v2870_v38, %v422_v33  ;;  %v413_v40 = vcvt.s32.f32 %v285_v34  ;;  %v421_v44 = vcvt.s32.f32 %v293_v21 }
  0xac   :  { %v654_v46 = vpack.c.bf16 %v590_v37, %v582_v30  ;;  %v581_v47 = vmul.f32 %v2874_v43, %v411_v39  ;;  %v589_v48 = vmul.f32 %v2874_v43, %v419_v41  ;;  %v176_v49 = vunpack.c.0.s8 %v144_v35 }
  0xad   :  { %v656_v51 = vpack.c.bf16 %v592_v42, %v584_v36  ;;  %v583_v52 = vmul.f32 %v2881_v50, %v413_v40  ;;  %v591_v16 = vmul.f32 %v2881_v50, %v421_v44  ;;  %v184_v53 = vunpack.c.1.s8 %v144_v35 }
  0xae   :  { %2002 = vmatprep.subr.bf16.mxu1 %v654_v46  ;;  %v653_v54 = vpack.c.bf16 %v589_v48, %v581_v47  ;;  %v304_v55 = vcvt.s32.f32 %v176_v49  ;;  %v4305_v38 = vsub.s32 5, %v2846_v2  ;;  %v178_v56 = vunpack.c.0.s8 %v146_v45  ;;  %v152_v47 = vld [vmem:[#allocation13 + $0x68] sm:$0xff] }
  0xaf   :  { %2043 = vmatprep.subr.bf16.mxu0 %v656_v51  ;;  %v655_v57 = vpack.c.bf16 %v591_v16, %v583_v52  ;;  %v312_v58 = vcvt.s32.f32 %v184_v53  ;;  %v186_v59 = vunpack.c.1.s8 %v146_v45  ;;  %v4309_v60 = vmov 0   ;;  %v154_v51 = vld [vmem:[#allocation13 + $0x78] sm:$0xff]  ;;  %v1301_v52 = vld [vmem:[%s4300_s8] sm:$0x3] }
  0xb0   :  { %2003 = vmatpush1.bf16.msra.mxu1 %v653_v54  ;;  %2020 = vmatprep.mubr.bf16.mxu1 %v4309_v60  ;;  %v2949_v43 = vrot.slane %v2858_v12, %v4305_v38  ;;  %v306_v50 = vcvt.s32.f32 %v178_v56  ;;  %v4304_v61 = vsub.s32 7, %v2846_v2  ;;  %v192_v9 = vunpack.c.2.s8 %v144_v35 }
  0xb1   :  { %2044 = vmatpush1.bf16.msra.mxu0 %v655_v57  ;;  %2061 = vmatprep.mubr.bf16.mxu0 %v4309_v60  ;;  %v314_v62 = vcvt.s32.f32 %v186_v59  ;;  %v200_v11 = vunpack.c.3.s8 %v144_v35  ;;  %v194_v13 = vunpack.c.2.s8 %v146_v45  ;;  %v202_v17 = vunpack.c.3.s8 %v146_v45 }
  0xb2   :  { %v474_v63 = vmul.f32 %v2949_v43, %v304_v55  ;;  %v482_v0 = vmul.f32 %v2949_v43, %v312_v58  ;;  %v2958_v1 = vrot.slane %v2858_v12, %v4304_v61  ;;  %v320_v15 = vcvt.s32.f32 %v192_v9  ;;  %v153_v9 = vld [vmem:[#allocation13 + $0x70] sm:$0xff] }
  0xb3   :  { %v328_v14 = vcvt.s32.f32 %v200_v11  ;;  %v322_v19 = vcvt.s32.f32 %v194_v13  ;;  %v330_v22 = vcvt.s32.f32 %v202_v17  ;;  %v175_v31 = vunpack.c.0.s8 %v143_v28 }
  0xb4   :  { %v602_v4 = vpack.c.bf16 %v482_v0, %v474_v63  ;;  %v476_v7 = vmul.f32 %v2958_v1, %v306_v50  ;;  %v484_v8 = vmul.f32 %v2958_v1, %v314_v62  ;;  %v2963_v20 = vmul.f32 %v2949_v43, %v320_v15  ;;  %v151_v50 = vld [vmem:[#allocation13 + $0x60] sm:$0xff] }
  0xb5   :  { %v2966_v24 = vmul.f32 %v2949_v43, %v328_v14  ;;  %v2969_v25 = vmul.f32 %v2958_v1, %v322_v19  ;;  %v2972_v23 = vmul.f32 %v2958_v1, %v330_v22  ;;  %v183_v32 = vunpack.c.1.s8 %v143_v28 }
  0xb6   :  { %2070 = vmatprep.subr.bf16.mxu1 %v602_v4  ;;  %v604_v10 = vpack.c.bf16 %v484_v8, %v476_v7  ;;  %v4306_v33 = vsub.s32 4, %v2846_v2  ;;  %v177_v34 = vunpack.c.0.s8 %v145_v29  ;;  %v185_v21 = vunpack.c.1.s8 %v145_v29 }
  0xb7   :  { %v4303_v35 = vsub.s32 6, %v2846_v2  ;;  %v303_v30 = vcvt.s32.f32 %v175_v31  ;;  %v311_v37 = vcvt.s32.f32 %v183_v32  ;;  %v191_v40 = vunpack.c.2.s8 %v143_v28  ;;  %v3125_v2 = vld [vmem:[#allocation13 + $0xf8] sm:$0xff] }
  0xb8   :  { %2111 = vmatprep.subr.bf16.mxu0 %v604_v10  ;;  %v2983_v39 = vrot.slane %v2858_v12, %v4306_v33  ;;  %v305_v41 = vcvt.s32.f32 %v177_v34  ;;  %v313_v36 = vcvt.s32.f32 %v185_v21  ;;  %v199_v44 = vunpack.c.3.s8 %v143_v28 }
  0xb9   :  { %v2988_v42 = vrot.slane %v2858_v12, %v4303_v35  ;;  %v193_v45 = vunpack.c.2.s8 %v145_v29  ;;  %v201_v46 = vunpack.c.3.s8 %v145_v29  ;;  %v319_v53 = vcvt.s32.f32 %v191_v40  ;;  %v161_v35 = vld [vmem:[#allocation13 + $0xb0] sm:$0xff] }
  0xba   :  { %v2991_v48 = vmul.f32 %v2983_v39, %v303_v30  ;;  %v2994_v49 = vmul.f32 %v2983_v39, %v311_v37  ;;  %v327_v54 = vcvt.s32.f32 %v199_v44  ;;  %v208_v55 = vunpack.c.0.s8 %v152_v47 }
  0xbb   :  { %v3000_v16 = vmul.f32 %v2988_v42, %v305_v41  ;;  %v3003_v12 = vmul.f32 %v2988_v42, %v313_v36  ;;  %v216_v56 = vunpack.c.1.s8 %v152_v47  ;;  %v321_v57 = vcvt.s32.f32 %v193_v45 }
  0xbc   :  { %v329_v58 = vcvt.s32.f32 %v201_v46  ;;  %v210_v59 = vunpack.c.0.s8 %v154_v51  ;;  %v3006_v62 = vrot.slane %v1301_v52, %v2849_v3  ;;  %v3009_v63 = vrot.slane %v1301_v52, %v2853_v6 }
  0xbd   :  { %v3016_v7 = vmul.f32 %v2983_v39, %v319_v53  ;;  %v3019_v8 = vmul.f32 %v2983_v39, %v327_v54  ;;  %v336_v10 = vcvt.s32.f32 %v208_v55  ;;  %v344_v11 = vcvt.s32.f32 %v216_v56  ;;  %v3036_v54 = vld [vmem:[#allocation13 + $0xa8] sm:$0xff] }
  0xbe   :  { %v218_v13 = vunpack.c.1.s8 %v154_v51  ;;  %v207_v15 = vunpack.c.0.s8 %v151_v50  ;;  %v3022_v17 = vmul.f32 %v2988_v42, %v321_v57  ;;  %v3025_v14 = vmul.f32 %v2988_v42, %v329_v58  ;;  %v3038_v57 = vld [vmem:[#allocation13 + $0xb8] sm:$0xff] }
  0xbf   :  { %v338_v19 = vcvt.s32.f32 %v210_v59  ;;  %v215_v22 = vunpack.c.1.s8 %v151_v50  ;;  %v209_v28 = vunpack.c.0.s8 %v153_v9  ;;  %v217_v29 = vunpack.c.1.s8 %v153_v9 }
  0xc0   :  { %v224_v31 = vunpack.c.2.s8 %v152_v47  ;;  %v232_v32 = vunpack.c.3.s8 %v152_v47  ;;  %v226_v34 = vunpack.c.2.s8 %v154_v51  ;;  %v234_v21 = vunpack.c.3.s8 %v154_v51 }
  0xc1   :  { %v223_v30 = vunpack.c.2.s8 %v151_v50  ;;  %v231_v37 = vunpack.c.3.s8 %v151_v50  ;;  %v3028_v41 = vmul.f32 %v2949_v43, %v336_v10  ;;  %v3031_v36 = vmul.f32 %v2949_v43, %v344_v11 }
  0xc2   :  { %v346_v40 = vcvt.s32.f32 %v218_v13  ;;  %v335_v44 = vcvt.s32.f32 %v207_v15  ;;  %v3034_v45 = vmul.f32 %v2958_v1, %v338_v19  ;;  %v343_v46 = vcvt.s32.f32 %v215_v22 }
  0xc3   :  { %v225_v52 = vunpack.c.2.s8 %v153_v9  ;;  %v233_v53 = vunpack.c.3.s8 %v153_v9  ;;  %v337_v47 = vcvt.s32.f32 %v209_v28  ;;  %v345_v51 = vcvt.s32.f32 %v217_v29 }
  0xc4   :  { %v352_v55 = vcvt.s32.f32 %v224_v31  ;;  %v360_v56 = vcvt.s32.f32 %v232_v32  ;;  %v354_v58 = vcvt.s32.f32 %v226_v34  ;;  %v362_v59 = vcvt.s32.f32 %v234_v21 }
  0xc5   :  { %v351_v50 = vcvt.s32.f32 %v223_v30  ;;  %v359_v10 = vcvt.s32.f32 %v231_v37  ;;  %v3041_v11 = vmul.f32 %v2958_v1, %v346_v40  ;;  %v3044_v13 = vmul.f32 %v2983_v39, %v335_v44 }
  0xc6   :  { %v240_v9 = vunpack.c.0.s8 %v3036_v54  ;;  %v248_v15 = vunpack.c.1.s8 %v3036_v54  ;;  %v3049_v19 = vmul.f32 %v2983_v39, %v343_v46  ;;  %v353_v22 = vcvt.s32.f32 %v225_v52 }
  0xc7   :  { %v361_v28 = vcvt.s32.f32 %v233_v53  ;;  %v242_v29 = vunpack.c.0.s8 %v3038_v57  ;;  %v3053_v31 = vmul.f32 %v2988_v42, %v337_v47  ;;  %v3056_v32 = vmul.f32 %v2988_v42, %v345_v51  ;;  %v159_v51 = vld [vmem:[#allocation13 + $0xa0] sm:$0xff] }
  0xc8   :  { %v3059_v34 = vmul.f32 %v2949_v43, %v352_v55  ;;  %v3062_v21 = vmul.f32 %v2949_v43, %v360_v56  ;;  %v3065_v30 = vmul.f32 %v2958_v1, %v354_v58  ;;  %v3068_v37 = vmul.f32 %v2958_v1, %v362_v59 }
  0xc9   :  { %v3071_v40 = vmul.f32 %v2983_v39, %v351_v50  ;;  %v3074_v44 = vmul.f32 %v2983_v39, %v359_v10  ;;  %v368_v52 = vcvt.s32.f32 %v240_v9  ;;  %v376_v53 = vcvt.s32.f32 %v248_v15  ;;  %v3112_v10 = vld [vmem:[#allocation13 + $0xe8] sm:$0xff] }
  0xca   :  { %v250_v47 = vunpack.c.1.s8 %v3038_v57  ;;  %v3082_v56 = vmul.f32 %v2988_v42, %v353_v22  ;;  %v3085_v58 = vmul.f32 %v2988_v42, %v361_v28  ;;  %v370_v59 = vcvt.s32.f32 %v242_v29 }
  0xcb   :  { %4351 = vst [vmem:[#allocation25_spill] sm:$0xff] %v3071_v40  ;;  %4352 = vst [vmem:[#allocation26_spill] sm:$0xff] %v3074_v44  ;;  %v239_v61 = vunpack.c.0.s8 %v159_v51  ;;  %v3102_v38 = vmul.f32 %v2949_v43, %v368_v52  ;;  %v3105_v33 = vmul.f32 %v2949_v43, %v376_v53  ;;  %v247_v18 = vunpack.c.1.s8 %v159_v51 }
  0xcc   :  { %4353 = vst [vmem:[#allocation27_spill] sm:$0xff] %v3082_v56  ;;  %4354 = vst [vmem:[#allocation28_spill] sm:$0xff] %v3085_v58  ;;  %v378_v5 = vcvt.s32.f32 %v250_v47  ;;  %v3110_v22 = vmul.f32 %v2958_v1, %v370_v59  ;;  %v241_v9 = vunpack.c.0.s8 %v161_v35  ;;  %v249_v28 = vunpack.c.1.s8 %v161_v35 }
  0xcd   :  { %4355 = vst [vmem:[#allocation29_spill] sm:$0xff] %v3102_v38  ;;  %4356 = vst [vmem:[#allocation30_spill] sm:$0xff] %v3105_v33  ;;  %v256_v29 = vunpack.c.2.s8 %v3036_v54  ;;  %v264_v52 = vunpack.c.3.s8 %v3036_v54  ;;  %v258_v50 = vunpack.c.2.s8 %v3038_v57  ;;  %v266_v53 = vunpack.c.3.s8 %v3038_v57 }
  0xce   :  { %4357 = vst [vmem:[#allocation31_spill] sm:$0xff] %v3110_v22  ;;  %v255_v47 = vunpack.c.2.s8 %v159_v51  ;;  %v263_v55 = vunpack.c.3.s8 %v159_v51  ;;  %v257_v46 = vunpack.c.2.s8 %v161_v35  ;;  %v265_v60 = vunpack.c.3.s8 %v161_v35 }
  0xcf   :  { %v367_v15 = vcvt.s32.f32 %v239_v61  ;;  %v375_v27 = vcvt.s32.f32 %v247_v18  ;;  %v272_v26 = vunpack.c.0.s8 %v3112_v10  ;;  %v3122_v4 = vmul.f32 %v2958_v1, %v378_v5 }
  0xd0   :  { %v369_v0 = vcvt.s32.f32 %v241_v9  ;;  %v377_v54 = vcvt.s32.f32 %v249_v28  ;;  %v280_v3 = vunpack.c.1.s8 %v3112_v10  ;;  %v384_v57 = vcvt.s32.f32 %v256_v29 }
  0xd1   :  { %4358 = vst [vmem:[#allocation32_spill] sm:$0xff] %v3122_v4  ;;  %v392_v51 = vcvt.s32.f32 %v264_v52  ;;  %v386_v6 = vcvt.s32.f32 %v258_v50  ;;  %v394_v35 = vcvt.s32.f32 %v266_v53  ;;  %v383_v56 = vcvt.s32.f32 %v255_v47 }
  0xd2   :  { %v391_v58 = vcvt.s32.f32 %v263_v55  ;;  %v385_v59 = vcvt.s32.f32 %v257_v46  ;;  %v393_v61 = vcvt.s32.f32 %v265_v60  ;;  %v3128_v18 = vmul.f32 %v2983_v39, %v367_v15  ;;  %v3141_v46 = vld [vmem:[#allocation13 + $0xe0] sm:$0xff]  ;;  %v169_v15 = vld [vmem:[#allocation13 + $0xf0] sm:$0xff] }
  0xd3   :  { %v3131_v5 = vmul.f32 %v2983_v39, %v375_v27  ;;  %v400_v9 = vcvt.s32.f32 %v272_v26  ;;  %v274_v28 = vunpack.c.0.s8 %v3125_v2  ;;  %v3135_v38 = vmul.f32 %v2988_v42, %v369_v0 }
  0xd4   :  { %4359 = vst [vmem:[#allocation33_spill] sm:$0xff] %v3128_v18  ;;  %v3138_v29 = vmul.f32 %v2988_v42, %v377_v54  ;;  %v408_v50 = vcvt.s32.f32 %v280_v3  ;;  %v282_v55 = vunpack.c.1.s8 %v3125_v2  ;;  %v3144_v60 = vmul.f32 %v2949_v43, %v384_v57 }
  0xd5   :  { %4360 = vst [vmem:[#allocation34_spill] sm:$0xff] %v3131_v5  ;;  %4361 = vst [vmem:[#allocation35_spill] sm:$0xff] %v3135_v38  ;;  %v3147_v27 = vmul.f32 %v2949_v43, %v392_v51  ;;  %v3150_v26 = vmul.f32 %v2958_v1, %v386_v6  ;;  %v3153_v0 = vmul.f32 %v2958_v1, %v394_v35  ;;  %v402_v6 = vcvt.s32.f32 %v274_v28 }
  0xd6   :  { %4362 = vst [vmem:[#allocation36_spill] sm:$0xff] %v3138_v29  ;;  %4363 = vst [vmem:[#allocation37_spill] sm:$0xff] %v3144_v60  ;;  %v3156_v52 = vmul.f32 %v2983_v39, %v383_v56  ;;  %v3159_v3 = vmul.f32 %v2983_v39, %v391_v58  ;;  %v3162_v53 = vmul.f32 %v2988_v42, %v385_v59  ;;  %v271_v57 = vunpack.c.0.s8 %v3141_v46  ;;  %v2501_v59 = vld [vmem:[#allocation11] ss:$0 sm:$0xff] }
  0xd7   :  { %4364 = vst [vmem:[#allocation38_spill] sm:$0xff] %v3147_v27  ;;  %4365 = vst [vmem:[#allocation39_spill] sm:$0xff] %v3150_v26  ;;  %v3165_v47 = vmul.f32 %v2988_v42, %v393_v61  ;;  %v3168_v54 = vmul.f32 %v2949_v43, %v400_v9  ;;  %v279_v51 = vunpack.c.1.s8 %v3141_v46  ;;  %v3173_v56 = vmul.f32 %v2949_v43, %v408_v50  ;;  %v3199_v26 = vld [vmem:[#allocation14 + $0x8] sm:$0xff] }
  0xd8   :  { %4366 = vst [vmem:[#allocation40_spill] sm:$0xff] %v3153_v0  ;;  %4367 = vst [vmem:[#allocation41_spill] sm:$0xff] %v3156_v52  ;;  %v410_v35 = vcvt.s32.f32 %v282_v55  ;;  %v273_v58 = vunpack.c.0.s8 %v169_v15  ;;  %v281_v33 = vunpack.c.1.s8 %v169_v15  ;;  %v288_v9 = vunpack.c.2.s8 %v3112_v10 }
  0xd9   :  { %4368 = vst [vmem:[#allocation42_spill] sm:$0xff] %v3159_v3  ;;  %4369 = vst [vmem:[#allocation43_spill] sm:$0xff] %v3162_v53  ;;  %v296_v28 = vunpack.c.3.s8 %v3112_v10  ;;  %v3192_v18 = vmul.f32 %v2958_v1, %v402_v6  ;;  %v399_v10 = vcvt.s32.f32 %v271_v57  ;;  %v407_v5 = vcvt.s32.f32 %v279_v51 }
  0xda   :  { %4370 = vst [vmem:[#allocation44_spill] sm:$0xff] %v3165_v47  ;;  %4371 = vst [vmem:[#allocation45_spill] sm:$0xff] %v3168_v54  ;;  %v3197_v50 = vmul.f32 %v2958_v1, %v410_v35  ;;  %v401_v60 = vcvt.s32.f32 %v273_v58  ;;  %v409_v55 = vcvt.s32.f32 %v281_v33  ;;  %v416_v52 = vcvt.s32.f32 %v288_v9 }
  0xdb   :  { %4372 = vst [vmem:[#allocation46_spill] sm:$0xff] %v3173_v56  ;;  %v424_v3 = vcvt.s32.f32 %v296_v28  ;;  %v290_v61 = vunpack.c.2.s8 %v3125_v2  ;;  %v298_v6 = vunpack.c.3.s8 %v3125_v2  ;;  %v287_v51 = vunpack.c.2.s8 %v3141_v46 }
  0xdc   :  { %v295_v40 = vunpack.c.3.s8 %v3141_v46  ;;  %v289_v54 = vunpack.c.2.s8 %v169_v15  ;;  %v3206_v58 = vmul.f32 %v2983_v39, %v399_v10  ;;  %v3209_v33 = vmul.f32 %v2983_v39, %v407_v5 }
  0xdd   :  { %v297_v9 = vunpack.c.3.s8 %v169_v15  ;;  %v790_v28 = vunpack.c.0.s8 %v3199_v26  ;;  %v3213_v2 = vmul.f32 %v2988_v42, %v401_v60  ;;  %v792_v46 = vunpack.c.1.s8 %v3199_v26 }
  0xde   :  { %v3220_v10 = vmul.f32 %v2949_v43, %v416_v52  ;;  %v3223_v5 = vmul.f32 %v2949_v43, %v424_v3  ;;  %v418_v15 = vcvt.s32.f32 %v290_v61  ;;  %v415_v0 = vcvt.s32.f32 %v287_v51 }
  0xdf   :  { %v417_v27 = vcvt.s32.f32 %v289_v54  ;;  %v425_v60 = vcvt.s32.f32 %v297_v9  ;;  %v1046_v38 = vcvt.s32.f32 %v790_v28  ;;  %v1048_v43 = vcvt.s32.f32 %v792_v46  ;;  %v728_v9 = vld [vmem:[#allocation14 + $0x18] sm:$0xff]  ;;  %v3253_v28 = vld [vmem:[#allocation14 + $0x10] sm:$0xff] }
  0xe0   :  { %v794_v51 = vunpack.c.2.s8 %v3199_v26  ;;  %v4374_v46 = vpack.c.bf16 %v3003_v12, %v3000_v16  ;;  %v796_v16 = vunpack.c.3.s8 %v3199_v26  ;;  %v802_v26 = vunpack.c.2.s8 %v728_v9 }
  0xe2   :  { %v4417_v52 = vld [vmem:[#allocation46_spill] sm:$0xff] }
 0x153   :  { %v1873_v44 = vpop.f32.mrb[0].mxu0 }
 0x154   :  { %v1874_v53 = vadd.f32 %v2501_v59, %v1873_v44  ;;  %v2512_v57 = vpop.f32.mrb[1].mxu0  ;;  %v3216_v44 = vmul.f32 %v2988_v42, %v409_v55  ;;  %v725_v59 = vld [vmem:[#allocation14] sm:$0xff] }
 0x155   :  { %v1876_v35 = vpop.f32.mrb[2].mxu0  ;;  %v426_v57 = vcvt.s32.f32 %v298_v6  ;;  %v789_v29 = vunpack.c.0.s8 %v725_v59  ;;  %v791_v55 = vunpack.c.1.s8 %v725_v59  ;;  %v3250_v6 = vmul.f32 %v2988_v42, %v417_v27 }
 0x156   :  { %v1879_v56 = vmul.f32 0.2, %v1874_v53  ;;  %v2513_v47 = vpop.f32.mrb[3].mxu0  ;;  %v795_v12 = vunpack.c.3.s8 %v725_v59 }
 0x157   :  { %v423_v47 = vcvt.s32.f32 %v295_v40  ;;  %v3239_v54 = vmul.f32 %v2958_v1, %v426_v57  ;;  %v1045_v27 = vcvt.s32.f32 %v789_v29  ;;  %v4375_v57 = vpack.c.bf16 %v2966_v24, %v2963_v20 }
 0x158   :  { %v1880_v35 = vmax.f32 %v1874_v53, %v1879_v56  ;;  %v3236_v53 = vmul.f32 %v2958_v1, %v418_v15  ;;  %v3244_v56 = vmul.f32 %v2983_v39, %v415_v0  ;;  %v4373_v1 = vpack.c.bf16 %v2994_v49, %v2991_v48 }
 0x159   :  { %v3247_v61 = vmul.f32 %v2983_v39, %v423_v47  ;;  %v3262_v0 = vmul.f32 %v2988_v42, %v425_v60  ;;  %v3265_v39 = vmul.f32 %v3006_v62, %v1046_v38  ;;  %v1047_v15 = vcvt.s32.f32 %v791_v55  ;;  %v4406_v55 = vld [vmem:[#allocation37_spill] sm:$0xff] }
 0x15a   :  { %v3225_v22 = vpack.c.bf16 %v1880_v35, %v1880_v35  ;;  %v4376_v48 = vpack.c.bf16 %v2972_v23, %v2969_v25  ;;  %v3274_v49 = vmul.f32 %v3006_v62, %v1048_v43  ;;  %v793_v42 = vunpack.c.2.s8 %v725_v59 }
 0x15b   :  { %v4377_v35 = vmov 0   ;;  %v798_v38 = vunpack.c.0.s8 %v728_v9  ;;  %v800_v29 = vunpack.c.1.s8 %v728_v9  ;;  %v797_v20 = vunpack.c.0.s8 %v3253_v28 }
 0x15c   :  { %2021 = vmatmul.mubr.bf16.vlgmr.msra.gmra.mrb[0].mxu1 %v3225_v22  ;;  %2062 = vmatmul.mubr.bf16.vlgmr.msra.gmra.mrb[4].mxu0 %v3225_v22  ;;  %v799_v24 = vunpack.c.1.s8 %v3253_v28  ;;  %v1050_v47 = vcvt.s32.f32 %v794_v51  ;;  %v4378_v59 = vpack.c.bf16 %v3019_v8, %v3016_v7  ;;  %v4379_v60 = vpack.c.bf16 %v3025_v14, %v3022_v17  ;;  %v4405_v8 = vld [vmem:[#allocation38_spill] sm:$0xff] }
 0x15d   :  { %2071 = vmatpush1.bf16.msra.mxu1 %v4373_v1  ;;  %2112 = vmatpush1.bf16.msra.mxu0 %v4374_v46  ;;  %v3294_v43 = vmul.f32 %v3009_v63, %v1045_v27  ;;  %v3297_v1 = vmul.f32 %v3009_v63, %v1047_v15  ;;  %v804_v46 = vunpack.c.3.s8 %v728_v9  ;;  %v4380_v51 = vpack.c.bf16 %v3031_v36, %v3028_v41  ;;  %v3307_v27 = vld [vmem:[#allocation14 + $0x28] sm:$0xff] }
 0x15e   :  { %2072 = vmatprep.subr.bf16.mxu1 %v4375_v57  ;;  %2113 = vmatprep.subr.bf16.mxu0 %v4376_v48  ;;  %v4381_v7 = vpack.c.bf16 %v3041_v11, %v3034_v45  ;;  %v1052_v17 = vcvt.s32.f32 %v796_v16  ;;  %v1049_v14 = vcvt.s32.f32 %v793_v42  ;;  %v1051_v57 = vcvt.s32.f32 %v795_v12 }
 0x15f   :  { %2102 = vmatprep.mubr.bf16.mxu1 %v4377_v35  ;;  %2143 = vmatprep.mubr.bf16.mxu0 %v4377_v35  ;;  %v1054_v48 = vcvt.s32.f32 %v798_v38  ;;  %v1056_v15 = vcvt.s32.f32 %v800_v29  ;;  %v1053_v35 = vcvt.s32.f32 %v797_v20  ;;  %v1055_v9 = vcvt.s32.f32 %v799_v24  ;;  %v3324_v20 = vld [vmem:[#allocation14 + $0x20] sm:$0xff]  ;;  %v3341_v24 = vld [vmem:[#allocation14 + $0x108] sm:$0xff] }
 0x160   :  { %v1058_v41 = vcvt.s32.f32 %v802_v26  ;;  %v801_v36 = vunpack.c.2.s8 %v3253_v28  ;;  %v803_v45 = vunpack.c.3.s8 %v3253_v28  ;;  %v4382_v11 = vpack.c.bf16 %v3049_v19, %v3044_v13 }
 0x161   :  { %2073 = vmatpush1.bf16.msra.mxu1 %v4378_v59  ;;  %2114 = vmatpush1.bf16.msra.mxu0 %v4379_v60  ;;  %v3310_v59 = vmul.f32 %v3006_v62, %v1050_v47  ;;  %v4383_v16 = vpack.c.bf16 %v3056_v32, %v3053_v31  ;;  %v1060_v12 = vcvt.s32.f32 %v804_v46  ;;  %v806_v38 = vunpack.c.0.s8 %v3307_v27 }
 0x162   :  { %2074 = vmatprep.subr.bf16.mxu1 %v4380_v51  ;;  %2115 = vmatprep.subr.bf16.mxu0 %v4381_v7  ;;  %v808_v29 = vunpack.c.1.s8 %v3307_v27  ;;  %v4384_v28 = vpack.c.bf16 %v3062_v21, %v3059_v34  ;;  %v4385_v13 = vpack.c.bf16 %v3068_v37, %v3065_v30  ;;  %v3333_v19 = vmul.f32 %v3006_v62, %v1052_v17  ;;  %v3355_v37 = vld [vmem:[#allocation14 + $0x100] sm:$0xff]  ;;  %v4386_v7 = vld [vmem:[#allocation26_spill] sm:$0xff]  ;;  %v4387_v17 = vld [vmem:[#allocation25_spill] sm:$0xff] }
 0x163   :  { %v3336_v31 = vmul.f32 %v3009_v63, %v1049_v14  ;;  %v3339_v32 = vmul.f32 %v3009_v63, %v1051_v57  ;;  %v3344_v47 = vmul.f32 %v3006_v62, %v1054_v48  ;;  %v3347_v34 = vmul.f32 %v3006_v62, %v1056_v15  ;;  %v4389_v57 = vld [vmem:[#allocation28_spill] sm:$0xff]  ;;  %v4390_v48 = vld [vmem:[#allocation27_spill] sm:$0xff] }
 0x164   :  { %v3350_v21 = vmul.f32 %v3009_v63, %v1053_v35  ;;  %v3353_v30 = vmul.f32 %v3009_v63, %v1055_v9  ;;  %v3358_v26 = vmul.f32 %v3006_v62, %v1058_v41  ;;  %v1057_v60 = vcvt.s32.f32 %v801_v36  ;;  %v4393_v36 = vld [vmem:[#allocation29_spill] sm:$0xff] }
 0x165   :  { %2075 = vmatpush1.bf16.msra.mxu1 %v4382_v11  ;;  %2116 = vmatpush1.bf16.msra.mxu0 %v4383_v16  ;;  %v1059_v46 = vcvt.s32.f32 %v803_v45  ;;  %v805_v51 = vunpack.c.0.s8 %v3324_v20  ;;  %v4388_v14 = vpack.c.bf16 %v4386_v7, %v4387_v17  ;;  %v4391_v15 = vpack.c.bf16 %v4389_v57, %v4390_v48  ;;  %v4392_v16 = vld [vmem:[#allocation30_spill] sm:$0xff]  ;;  %v4403_v17 = vld [vmem:[#allocation35_spill] sm:$0xff] }
 0x166   :  { %2076 = vmatprep.subr.bf16.mxu1 %v4384_v28  ;;  %2117 = vmatprep.subr.bf16.mxu0 %v4385_v13  ;;  %v3368_v35 = vmul.f32 %v3006_v62, %v1060_v12  ;;  %v1062_v9 = vcvt.s32.f32 %v806_v38  ;;  %v1064_v11 = vcvt.s32.f32 %v808_v29  ;;  %v918_v41 = vunpack.c.0.s8 %v3341_v24  ;;  %v4396_v13 = vld [vmem:[#allocation31_spill] sm:$0xff]  ;;  %v4402_v29 = vld [vmem:[#allocation36_spill] sm:$0xff] }
 0x167   :  { %v4394_v45 = vpack.c.bf16 %v4392_v16, %v4393_v36  ;;  %v4395_v28 = vmov %v3122_v4  ;;  %v920_v12 = vunpack.c.1.s8 %v3341_v24  ;;  %v917_v38 = vunpack.c.0.s8 %v3355_v37 }
 0x168   :  { %v4397_v42 = vpack.c.bf16 %v4395_v28, %v4396_v13  ;;  %v807_v57 = vunpack.c.1.s8 %v3324_v20  ;;  %v3390_v48 = vmul.f32 %v3009_v63, %v1057_v60  ;;  %v1061_v16 = vcvt.s32.f32 %v805_v51  ;;  %v4400_v28 = vld [vmem:[#allocation33_spill] sm:$0xff] }
 0x169   :  { %2077 = vmatpush1.bf16.msra.mxu1 %v4388_v14  ;;  %2118 = vmatpush1.bf16.msra.mxu0 %v4391_v15  ;;  %v3393_v15 = vmul.f32 %v3009_v63, %v1059_v46  ;;  %v810_v36 = vunpack.c.2.s8 %v3307_v27  ;;  %v4404_v14 = vpack.c.bf16 %v4402_v29, %v4403_v17  ;;  %v3405_v60 = vmul.f32 %v3006_v62, %v1062_v9  ;;  %v760_v9 = vld [vmem:[#allocation14 + $0x118] sm:$0xff] }
 0x16a   :  { %2078 = vmatprep.subr.bf16.mxu1 %v4394_v45  ;;  %2119 = vmatprep.subr.bf16.mxu0 %v4397_v42  ;;  %v919_v42 = vunpack.c.1.s8 %v3355_v37  ;;  %4398 = vst [vmem:[#allocation26_spill] sm:$0xff] %v3390_v48  ;;  %v4399_v45 = vld [vmem:[#allocation34_spill] sm:$0xff]  ;;  %v3408_v46 = vmul.f32 %v3006_v62, %v1064_v11  ;;  %v1174_v51 = vcvt.s32.f32 %v918_v41  ;;  %v4407_v23 = vpack.c.bf16 %v4405_v8, %v4406_v55 }
 0x16b   :  { %v4401_v13 = vpack.c.bf16 %v4399_v45, %v4400_v28  ;;  %v4408_v45 = vld [vmem:[#allocation40_spill] sm:$0xff]  ;;  %v4409_v28 = vld [vmem:[#allocation39_spill] sm:$0xff]  ;;  %v1176_v17 = vcvt.s32.f32 %v920_v12  ;;  %v1173_v29 = vcvt.s32.f32 %v917_v38  ;;  %v924_v7 = vunpack.c.3.s8 %v3341_v24  ;;  %v3426_v38 = vld [vmem:[#allocation14 + $0x110] sm:$0xff] }
 0x16c   :  { %v1063_v25 = vcvt.s32.f32 %v807_v57  ;;  %v812_v11 = vunpack.c.3.s8 %v3307_v27  ;;  %v1175_v40 = vcvt.s32.f32 %v919_v42  ;;  %v921_v41 = vunpack.c.2.s8 %v3355_v37  ;;  %v4414_v57 = vld [vmem:[#allocation44_spill] sm:$0xff]  ;;  %v4415_v27 = vld [vmem:[#allocation43_spill] sm:$0xff] }
 0x16d   :  { %2079 = vmatpush1.bf16.msra.mxu1 %v4401_v13  ;;  %2120 = vmatpush1.bf16.msra.mxu0 %v4404_v14  ;;  %v4410_v13 = vpack.c.bf16 %v4408_v45, %v4409_v28  ;;  %v922_v14 = vunpack.c.2.s8 %v3341_v24  ;;  %v3423_v55 = vmul.f32 %v3009_v63, %v1061_v16  ;;  %v1066_v8 = vcvt.s32.f32 %v810_v36  ;;  %v4411_v45 = vld [vmem:[#allocation42_spill] sm:$0xff]  ;;  %v4412_v24 = vld [vmem:[#allocation41_spill] sm:$0xff] }
 0x16e   :  { %2080 = vmatprep.subr.bf16.mxu1 %v4407_v23  ;;  %v809_v12 = vunpack.c.2.s8 %v3324_v20  ;;  %v4413_v28 = vpack.c.bf16 %v4411_v45, %v4412_v24  ;;  %v4416_v42 = vpack.c.bf16 %v4414_v57, %v4415_v27  ;;  %v923_v23 = vunpack.c.3.s8 %v3355_v37  ;;  %v4418_v36 = vld [vmem:[#allocation45_spill] sm:$0xff] }
 0x16f   :  { %2121 = vmatprep.subr.bf16.mxu0 %v4410_v13  ;;  %v1442_v13 = vmul.f32 %v3006_v62, %v1174_v51  ;;  %v926_v3 = vunpack.c.0.s8 %v760_v9  ;;  %v928_v16 = vunpack.c.1.s8 %v760_v9  ;;  %v4419_v4 = vpack.c.bf16 %v4417_v52, %v4418_v36  ;;  %v3470_v36 = vld [vmem:[#allocation14 + $0x38] sm:$0xff] }
 0x170   :  { %v4420_v48 = vpack.c.bf16 %v3197_v50, %v3192_v18  ;;  %v1444_v45 = vmul.f32 %v3006_v62, %v1176_v17  ;;  %v1441_v24 = vmul.f32 %v3009_v63, %v1173_v29  ;;  %v1180_v57 = vcvt.s32.f32 %v924_v7 }
 0x171   :  { %2081 = vmatpush1.bf16.msra.mxu1 %v4413_v28  ;;  %2122 = vmatpush1.bf16.msra.mxu0 %v4416_v42  ;;  %v1178_v28 = vcvt.s32.f32 %v922_v14  ;;  %v1443_v51 = vmul.f32 %v3009_v63, %v1175_v40  ;;  %v1177_v27 = vcvt.s32.f32 %v921_v41  ;;  %v925_v37 = vunpack.c.0.s8 %v3426_v38 }
 0x172   :  { %2082 = vmatprep.subr.bf16.mxu1 %v4419_v4  ;;  %2123 = vmatprep.subr.bf16.mxu0 %v4420_v48  ;;  %v927_v42 = vunpack.c.1.s8 %v3426_v38  ;;  %v1578_v4 = vpack.c.bf16 %v3408_v46, %v3405_v60  ;;  %v3450_v52 = vmul.f32 %v3009_v63, %v1063_v25  ;;  %v930_v18 = vunpack.c.2.s8 %v760_v9 }
 0x173   :  { %v932_v50 = vunpack.c.3.s8 %v760_v9  ;;  %v4421_v48 = vpack.c.bf16 %v3209_v33, %v3206_v58  ;;  %v4422_v40 = vpack.c.bf16 %v3216_v44, %v3213_v2  ;;  %v3459_v7 = vmul.f32 %v3006_v62, %v1066_v8 }
 0x174   :  { %v1179_v17 = vcvt.s32.f32 %v923_v23  ;;  %v1182_v29 = vcvt.s32.f32 %v926_v3  ;;  %v1184_v14 = vcvt.s32.f32 %v928_v16  ;;  %v4423_v25 = vpack.c.bf16 %v3223_v5, %v3220_v10  ;;  %v762_v16 = vld [vmem:[#allocation14 + $0x128] sm:$0xff] }
 0x175   :  { %2083 = vmatpush1.bf16.msra.mxu1 %v4421_v48  ;;  %2124 = vmatpush1.bf16.msra.mxu0 %v4422_v40  ;;  %v4424_v9 = vpack.c.bf16 %v3239_v54, %v3236_v53  ;;  %v1068_v58 = vcvt.s32.f32 %v812_v11  ;;  %v1634_v33 = vpack.c.bf16 %v1444_v45, %v1442_v13  ;;  %v1446_v41 = vmul.f32 %v3006_v62, %v1178_v28 }
 0x176   :  { %2084 = vmatprep.subr.bf16.mxu1 %v4423_v25  ;;  %v1448_v2 = vmul.f32 %v3006_v62, %v1180_v57  ;;  %v1633_v44 = vpack.c.bf16 %v1443_v51, %v1441_v24  ;;  %v1445_v8 = vmul.f32 %v3009_v63, %v1177_v27  ;;  %v1181_v23 = vcvt.s32.f32 %v925_v37  ;;  %v761_v27 = vld [vmem:[#allocation14 + $0x120] sm:$0xff] }
 0x177   :  { %2125 = vmatprep.subr.bf16.mxu0 %v4424_v9  ;;  %v1183_v3 = vcvt.s32.f32 %v927_v42  ;;  %v1186_v10 = vcvt.s32.f32 %v930_v18  ;;  %v1188_v5 = vcvt.s32.f32 %v932_v50  ;;  %v929_v48 = vunpack.c.2.s8 %v3426_v38 }
 0x178   :  { %v931_v53 = vunpack.c.3.s8 %v3426_v38  ;;  %v4425_v54 = vpack.c.bf16 %v3247_v61, %v3244_v56  ;;  %v4426_v11 = vpack.c.bf16 %v3262_v0, %v3250_v6  ;;  %v811_v13 = vunpack.c.3.s8 %v3324_v20 }
 0x179   :  { %v1447_v45 = vmul.f32 %v3009_v63, %v1179_v17  ;;  %v1450_v24 = vmul.f32 %v3006_v62, %v1182_v29  ;;  %v1452_v28 = vmul.f32 %v3006_v62, %v1184_v14  ;;  %v4427_v57 = vpack.c.bf16 %v3274_v49, %v3265_v39  ;;  %v3493_v39 = vld [vmem:[#allocation14 + $0x30] sm:$0xff] }
 0x17a   :  { %2085 = vmatpush1.bf16.msra.mxu1 %v4425_v54  ;;  %2126 = vmatpush1.bf16.msra.mxu0 %v4426_v11  ;;  %v1065_v38 = vcvt.s32.f32 %v809_v12  ;;  %v1636_v56 = vpack.c.bf16 %v1448_v2, %v1446_v41  ;;  %v934_v61 = vunpack.c.0.s8 %v762_v16  ;;  %v936_v51 = vunpack.c.1.s8 %v762_v16 }
 0x17b   :  { %2316 = vmatprep.subr.bf16.mxu0 %v4427_v57  ;;  %2398 = vmatprep.subr.bf16.mxu1 %v1634_v33  ;;  %v814_v6 = vunpack.c.0.s8 %v3470_v36  ;;  %v816_v0 = vunpack.c.1.s8 %v3470_v36  ;;  %v1449_v20 = vmul.f32 %v3009_v63, %v1181_v23  ;;  %v1451_v37 = vmul.f32 %v3009_v63, %v1183_v3 }
 0x17c   :  { %v1454_v49 = vmul.f32 %v3006_v62, %v1186_v10  ;;  %v1456_v12 = vmul.f32 %v3006_v62, %v1188_v5  ;;  %v1185_v42 = vcvt.s32.f32 %v929_v48  ;;  %v1187_v18 = vcvt.s32.f32 %v931_v53 }
 0x17d   :  { %2103 = vmatmul.mubr.bf16.vlgmr.msra.gmra.mrb[4].mxu1 %v3225_v22  ;;  %2144 = vmatmul.mubr.bf16.vlgmr.msra.gmra.mrb[8].mxu0 %v3225_v22  ;;  %v4428_v50 = vpack.c.bf16 %v3297_v1, %v3294_v43  ;;  %v1635_v40 = vpack.c.bf16 %v1447_v45, %v1445_v8  ;;  %v1638_v17 = vpack.c.bf16 %v1452_v28, %v1450_v24  ;;  %v933_v29 = vunpack.c.0.s8 %v761_v27 }
 0x17e   :  { %2399 = vmatpush1.bf16.msra.mxu1 %v1633_v44  ;;  %v935_v14 = vunpack.c.1.s8 %v761_v27  ;;  %v4429_v22 = vpack.c.bf16 %v3333_v19, %v3310_v59  ;;  %v1190_v25 = vcvt.s32.f32 %v934_v61  ;;  %v1192_v9 = vcvt.s32.f32 %v936_v51  ;;  %v3530_v61 = vld [vmem:[#allocation14 + $0x48] sm:$0xff] }
 0x17f   :  { %2317 = vmatpush1.bf16.msra.mxu0 %v4428_v50  ;;  %2400 = vmatprep.subr.bf16.mxu1 %v1636_v56  ;;  %v938_v33 = vunpack.c.2.s8 %v762_v16  ;;  %v940_v41 = vunpack.c.3.s8 %v762_v16  ;;  %v1577_v2 = vpack.c.bf16 %v3450_v52, %v3423_v55  ;;  %v3506_v43 = vmul.f32 %v3006_v62, %v1068_v58 }
 0x180   :  { %2318 = vmatprep.subr.bf16.mxu0 %v4429_v22  ;;  %v1067_v1 = vcvt.s32.f32 %v811_v13  ;;  %v813_v44 = vunpack.c.0.s8 %v3493_v39  ;;  %v1637_v8 = vpack.c.bf16 %v1451_v37, %v1449_v20  ;;  %v1640_v23 = vpack.c.bf16 %v1456_v12, %v1454_v49 }
 0x181   :  { %v1453_v3 = vmul.f32 %v3009_v63, %v1185_v42  ;;  %v1455_v59 = vmul.f32 %v3009_v63, %v1187_v18  ;;  %v4430_v19 = vpack.c.bf16 %v3339_v32, %v3336_v31  ;;  %v1189_v16 = vcvt.s32.f32 %v933_v29  ;;  %v733_v29 = vld [vmem:[#allocation14 + $0x40] sm:$0xff] }
 0x182   :  { %2401 = vmatpush1.bf16.msra.mxu1 %v1635_v40  ;;  %v1191_v10 = vcvt.s32.f32 %v935_v14  ;;  %v937_v5 = vunpack.c.2.s8 %v761_v27  ;;  %v939_v48 = vunpack.c.3.s8 %v761_v27  ;;  %v4431_v58 = vpack.c.bf16 %v3347_v34, %v3344_v47  ;;  %v4434_v40 = vld [vmem:[#allocation26_spill] sm:$0xff] }
 0x183   :  { %2319 = vmatpush1.bf16.msra.mxu0 %v4430_v19  ;;  %2402 = vmatprep.subr.bf16.mxu1 %v1638_v17  ;;  %v1458_v53 = vmul.f32 %v3006_v62, %v1190_v25  ;;  %v1460_v54 = vmul.f32 %v3006_v62, %v1192_v9  ;;  %v1194_v11 = vcvt.s32.f32 %v938_v33  ;;  %v1196_v13 = vcvt.s32.f32 %v940_v41 }
 0x184   :  { %2320 = vmatprep.subr.bf16.mxu0 %v4431_v58  ;;  %v3520_v45 = vmul.f32 %v3009_v63, %v1065_v38  ;;  %v1070_v31 = vcvt.s32.f32 %v814_v6  ;;  %v1072_v32 = vcvt.s32.f32 %v816_v0  ;;  %v815_v24 = vunpack.c.1.s8 %v3493_v39 }
 0x185   :  { %v3524_v28 = vmul.f32 %v3009_v63, %v1067_v1  ;;  %v1069_v57 = vcvt.s32.f32 %v813_v44  ;;  %v818_v47 = vunpack.c.2.s8 %v3470_v36  ;;  %v1639_v34 = vpack.c.bf16 %v1455_v59, %v1453_v3  ;;  %v736_v59 = vld [vmem:[#allocation14 + $0x58] sm:$0xff] }
 0x186   :  { %v4432_v56 = vpack.c.bf16 %v3353_v30, %v3350_v21  ;;  %2403 = vmatpush1.bf16.msra.mxu1 %v1637_v8  ;;  %v1457_v38 = vmul.f32 %v3009_v63, %v1189_v16  ;;  %v1459_v51 = vmul.f32 %v3009_v63, %v1191_v10  ;;  %v1193_v27 = vcvt.s32.f32 %v937_v5 }
 0x187   :  { %v1195_v6 = vcvt.s32.f32 %v939_v48  ;;  %v4433_v0 = vpack.c.bf16 %v3368_v35, %v3358_v26  ;;  %v820_v20 = vunpack.c.3.s8 %v3470_v36  ;;  %2404 = vmatprep.subr.bf16.mxu1 %v1640_v23  ;;  %v1642_v37 = vpack.c.bf16 %v1460_v54, %v1458_v53 }
 0x188   :  { %2321 = vmatpush1.bf16.msra.mxu0 %v4432_v56  ;;  %v1462_v21 = vmul.f32 %v3006_v62, %v1194_v11  ;;  %v1464_v30 = vmul.f32 %v3006_v62, %v1196_v13  ;;  %v1338_v49 = vmul.f32 %v3006_v62, %v1070_v31  ;;  %v1340_v12 = vmul.f32 %v3006_v62, %v1072_v32  ;;  %v735_v13 = vld [vmem:[#allocation14 + $0x50] sm:$0xff] }
 0x189   :  { %2322 = vmatprep.subr.bf16.mxu0 %v4433_v0  ;;  %v1071_v42 = vcvt.s32.f32 %v815_v24  ;;  %v817_v18 = vunpack.c.2.s8 %v3493_v39  ;;  %v1580_v50 = vpack.c.bf16 %v3506_v43, %v3459_v7  ;;  %v819_v26 = vunpack.c.3.s8 %v3493_v39 }
 0x18a   :  { %v822_v35 = vunpack.c.0.s8 %v3530_v61  ;;  %v824_v36 = vunpack.c.1.s8 %v3530_v61  ;;  %v4435_v17 = vpack.c.bf16 %v3393_v15, %v4434_v40  ;;  %2405 = vmatpush1.bf16.msra.mxu1 %v1639_v34  ;;  %v1641_v14 = vpack.c.bf16 %v1459_v51, %v1457_v38 }
 0x18b   :  { %v1461_v22 = vmul.f32 %v3009_v63, %v1193_v27  ;;  %v1463_v25 = vmul.f32 %v3009_v63, %v1195_v6  ;;  %v1579_v7 = vpack.c.bf16 %v3524_v28, %v3520_v45  ;;  %v1074_v39 = vcvt.s32.f32 %v818_v47  ;;  %2406 = vmatprep.subr.bf16.mxu1 %v1642_v37 }
 0x18c   :  { %2323 = vmatpush1.bf16.msra.mxu0 %v4435_v17  ;;  %v1076_v9 = vcvt.s32.f32 %v820_v20  ;;  %v1644_v33 = vpack.c.bf16 %v1464_v30, %v1462_v21  ;;  %v1582_v15 = vpack.c.bf16 %v1340_v12, %v1338_v49  ;;  %v1337_v41 = vmul.f32 %v3009_v63, %v1069_v57 }
 0x18d   :  { %2324 = vmatprep.subr.bf16.mxu0 %v1578_v4  ;;  %v1339_v43 = vmul.f32 %v3009_v63, %v1071_v42  ;;  %v1073_v1 = vcvt.s32.f32 %v817_v18  ;;  %v1075_v44 = vcvt.s32.f32 %v819_v26  ;;  %v1078_v8 = vcvt.s32.f32 %v822_v35  ;;  %v738_v35 = vld [vmem:[#allocation14 + $0x68] sm:$0xff] }
 0x18e   :  { %v1080_v23 = vcvt.s32.f32 %v824_v36  ;;  %v821_v3 = vunpack.c.0.s8 %v733_v29  ;;  %v823_v60 = vunpack.c.1.s8 %v733_v29  ;;  %v826_v46 = vunpack.c.2.s8 %v3530_v61  ;;  %2407 = vmatpush1.bf16.msra.mxu1 %v1641_v14  ;;  %v737_v14 = vld [vmem:[#allocation14 + $0x60] sm:$0xff] }
 0x18f   :  { %v828_v4 = vunpack.c.3.s8 %v3530_v61  ;;  %v1643_v19 = vpack.c.bf16 %v1463_v25, %v1461_v22  ;;  %v1342_v16 = vmul.f32 %v3006_v62, %v1074_v39  ;;  %v1344_v10 = vmul.f32 %v3006_v62, %v1076_v9  ;;  %2408 = vmatprep.subr.bf16.mxu1 %v1644_v33 }
 0x190   :  { %2325 = vmatpush1.bf16.msra.mxu0 %v1577_v2  ;;  %v825_v5 = vunpack.c.2.s8 %v733_v29  ;;  %v827_v48 = vunpack.c.3.s8 %v733_v29  ;;  %v1581_v58 = vpack.c.bf16 %v1339_v43, %v1337_v41  ;;  %v830_v53 = vunpack.c.0.s8 %v736_v59 }
 0x191   :  { %2326 = vmatprep.subr.bf16.mxu0 %v1580_v50  ;;  %v832_v54 = vunpack.c.1.s8 %v736_v59  ;;  %v1341_v55 = vmul.f32 %v3009_v63, %v1073_v1  ;;  %v1343_v52 = vmul.f32 %v3009_v63, %v1075_v44  ;;  %v1346_v2 = vmul.f32 %v3006_v62, %v1078_v8 }
 0x192   :  { %v1348_v11 = vmul.f32 %v3006_v62, %v1080_v23  ;;  %v1077_v45 = vcvt.s32.f32 %v821_v3  ;;  %v1079_v31 = vcvt.s32.f32 %v823_v60  ;;  %v1082_v32 = vcvt.s32.f32 %v826_v46  ;;  %2409 = vmatpush1.bf16.msra.mxu1 %v1643_v19 }
 0x193   :  { %v1084_v24 = vcvt.s32.f32 %v828_v4  ;;  %v1584_v28 = vpack.c.bf16 %v1344_v10, %v1342_v16  ;;  %v1081_v57 = vcvt.s32.f32 %v825_v5  ;;  %v1083_v47 = vcvt.s32.f32 %v827_v48 }
 0x194   :  { %2327 = vmatpush1.bf16.msra.mxu0 %v1579_v7  ;;  %v1086_v34 = vcvt.s32.f32 %v830_v53  ;;  %v1088_v56 = vcvt.s32.f32 %v832_v54  ;;  %v829_v61 = vunpack.c.0.s8 %v735_v13  ;;  %v831_v38 = vunpack.c.1.s8 %v735_v13 }
 0x195   :  { %2328 = vmatprep.subr.bf16.mxu0 %v1582_v15  ;;  %v1583_v51 = vpack.c.bf16 %v1343_v52, %v1341_v55  ;;  %v1586_v27 = vpack.c.bf16 %v1348_v11, %v1346_v2  ;;  %v1345_v6 = vmul.f32 %v3009_v63, %v1077_v45  ;;  %v1347_v0 = vmul.f32 %v3009_v63, %v1079_v31 }
 0x196   :  { %v1350_v20 = vmul.f32 %v3006_v62, %v1082_v32  ;;  %v1352_v37 = vmul.f32 %v3006_v62, %v1084_v24  ;;  %v1349_v21 = vmul.f32 %v3009_v63, %v1081_v57  ;;  %v1351_v30 = vmul.f32 %v3009_v63, %v1083_v47 }
 0x197   :  { %v834_v49 = vunpack.c.2.s8 %v736_v59  ;;  %v836_v12 = vunpack.c.3.s8 %v736_v59  ;;  %v1354_v42 = vmul.f32 %v3006_v62, %v1086_v34  ;;  %v1356_v18 = vmul.f32 %v3006_v62, %v1088_v56 }
 0x198   :  { %2329 = vmatpush1.bf16.msra.mxu0 %v1581_v58  ;;  %v1085_v50 = vcvt.s32.f32 %v829_v61  ;;  %v1087_v26 = vcvt.s32.f32 %v831_v38  ;;  %v833_v36 = vunpack.c.2.s8 %v735_v13  ;;  %v835_v40 = vunpack.c.3.s8 %v735_v13  ;;  %v764_v38 = vld [vmem:[#allocation14 + $0x138] sm:$0xff] }
 0x199   :  { %2330 = vmatprep.subr.bf16.mxu0 %v1584_v28  ;;  %v1585_v17 = vpack.c.bf16 %v1347_v0, %v1345_v6  ;;  %v1588_v29 = vpack.c.bf16 %v1352_v37, %v1350_v20  ;;  %v1090_v22 = vcvt.s32.f32 %v834_v49  ;;  %v1092_v25 = vcvt.s32.f32 %v836_v12  ;;  %v740_v20 = vld [vmem:[#allocation14 + $0x78] sm:$0xff]  ;;  %v763_v37 = vld [vmem:[#allocation14 + $0x130] sm:$0xff] }
 0x19a   :  { %v838_v7 = vunpack.c.0.s8 %v738_v35  ;;  %v840_v39 = vunpack.c.1.s8 %v738_v35  ;;  %v1587_v9 = vpack.c.bf16 %v1351_v30, %v1349_v21  ;;  %v1590_v33 = vpack.c.bf16 %v1356_v18, %v1354_v42  ;;  %v739_v42 = vld [vmem:[#allocation14 + $0x70] sm:$0xff] }
 0x19b   :  { %v1353_v15 = vmul.f32 %v3009_v63, %v1085_v50  ;;  %v1355_v41 = vmul.f32 %v3009_v63, %v1087_v26  ;;  %v1089_v43 = vcvt.s32.f32 %v833_v36  ;;  %v1091_v1 = vcvt.s32.f32 %v835_v40 }
 0x19c   :  { %2331 = vmatpush1.bf16.msra.mxu0 %v1583_v51  ;;  %v837_v44 = vunpack.c.0.s8 %v737_v14  ;;  %v839_v8 = vunpack.c.1.s8 %v737_v14  ;;  %v842_v23 = vunpack.c.2.s8 %v738_v35  ;;  %v844_v3 = vunpack.c.3.s8 %v738_v35 }
 0x19d   :  { %2332 = vmatprep.subr.bf16.mxu0 %v1586_v27  ;;  %v841_v59 = vunpack.c.2.s8 %v737_v14  ;;  %v843_v60 = vunpack.c.3.s8 %v737_v14  ;;  %v1358_v46 = vmul.f32 %v3006_v62, %v1090_v22  ;;  %v1360_v4 = vmul.f32 %v3006_v62, %v1092_v25 }
 0x19e   :  { %v1094_v19 = vcvt.s32.f32 %v838_v7  ;;  %v1096_v16 = vcvt.s32.f32 %v840_v39  ;;  %v1589_v10 = vpack.c.bf16 %v1355_v41, %v1353_v15  ;;  %v1357_v5 = vmul.f32 %v3009_v63, %v1089_v43 }
 0x19f   :  { %v1359_v48 = vmul.f32 %v3009_v63, %v1091_v1  ;;  %v1093_v58 = vcvt.s32.f32 %v837_v44  ;;  %v1095_v53 = vcvt.s32.f32 %v839_v8  ;;  %v1098_v54 = vcvt.s32.f32 %v842_v23 }
 0x1a0   :  { %2333 = vmatpush1.bf16.msra.mxu0 %v1585_v17  ;;  %v1100_v55 = vcvt.s32.f32 %v844_v3  ;;  %v1097_v52 = vcvt.s32.f32 %v841_v59  ;;  %v1099_v2 = vcvt.s32.f32 %v843_v60  ;;  %v1592_v11 = vpack.c.bf16 %v1360_v4, %v1358_v46 }
 0x1a1   :  { %2334 = vmatprep.subr.bf16.mxu0 %v1588_v29  ;;  %v1362_v13 = vmul.f32 %v3006_v62, %v1094_v19  ;;  %v1364_v45 = vmul.f32 %v3006_v62, %v1096_v16  ;;  %v1591_v31 = vpack.c.bf16 %v1359_v48, %v1357_v5  ;;  %v1361_v32 = vmul.f32 %v3009_v63, %v1093_v58 }
 0x1a2   :  { %v1363_v24 = vmul.f32 %v3009_v63, %v1095_v53  ;;  %v1366_v28 = vmul.f32 %v3006_v62, %v1098_v54  ;;  %v1368_v57 = vmul.f32 %v3006_v62, %v1100_v55  ;;  %v1365_v47 = vmul.f32 %v3009_v63, %v1097_v52 }
 0x1a3   :  { %v1367_v34 = vmul.f32 %v3009_v63, %v1099_v2  ;;  %v1594_v56 = vpack.c.bf16 %v1364_v45, %v1362_v13  ;;  %v942_v6 = vunpack.c.0.s8 %v764_v38  ;;  %v944_v0 = vunpack.c.1.s8 %v764_v38  ;;  %v766_v2 = vld [vmem:[#allocation14 + $0x148] sm:$0xff] }
 0x1a4   :  { %2335 = vmatpush1.bf16.msra.mxu0 %v1587_v9  ;;  %v1593_v61 = vpack.c.bf16 %v1363_v24, %v1361_v32  ;;  %v1596_v51 = vpack.c.bf16 %v1368_v57, %v1366_v28  ;;  %v846_v21 = vunpack.c.0.s8 %v740_v20  ;;  %v848_v30 = vunpack.c.1.s8 %v740_v20  ;;  %v3604_v32 = vld [vmem:[#allocation14 + $0x88] sm:$0xff] }
 0x1a5   :  { %2336 = vmatprep.subr.bf16.mxu0 %v1590_v33  ;;  %v1595_v27 = vpack.c.bf16 %v1367_v34, %v1365_v47  ;;  %v941_v49 = vunpack.c.0.s8 %v763_v37  ;;  %v943_v12 = vunpack.c.1.s8 %v763_v37  ;;  %v1198_v18 = vcvt.s32.f32 %v942_v6  ;;  %v765_v34 = vld [vmem:[#allocation14 + $0x140] sm:$0xff] }
 0x1a6   :  { %v1200_v50 = vcvt.s32.f32 %v944_v0  ;;  %v845_v26 = vunpack.c.0.s8 %v739_v42  ;;  %v847_v35 = vunpack.c.1.s8 %v739_v42  ;;  %v1102_v36 = vcvt.s32.f32 %v846_v21 }
 0x1a7   :  { %v1104_v40 = vcvt.s32.f32 %v848_v30  ;;  %v1197_v17 = vcvt.s32.f32 %v941_v49  ;;  %v1199_v29 = vcvt.s32.f32 %v943_v12  ;;  %v1466_v14 = vmul.f32 %v3006_v62, %v1198_v18 }
 0x1a8   :  { %2337 = vmatpush1.bf16.msra.mxu0 %v1589_v10  ;;  %v1468_v22 = vmul.f32 %v3006_v62, %v1200_v50  ;;  %v1101_v25 = vcvt.s32.f32 %v845_v26  ;;  %v1103_v7 = vcvt.s32.f32 %v847_v35  ;;  %v1370_v39 = vmul.f32 %v3006_v62, %v1102_v36 }
 0x1a9   :  { %2338 = vmatprep.subr.bf16.mxu0 %v1592_v11  ;;  %v1372_v9 = vmul.f32 %v3006_v62, %v1104_v40  ;;  %v1465_v33 = vmul.f32 %v3009_v63, %v1197_v17  ;;  %v1467_v15 = vmul.f32 %v3009_v63, %v1199_v29  ;;  %v946_v3 = vunpack.c.2.s8 %v764_v38 }
 0x1aa   :  { %v1646_v41 = vpack.c.bf16 %v1468_v22, %v1466_v14  ;;  %v1369_v43 = vmul.f32 %v3009_v63, %v1101_v25  ;;  %v1371_v1 = vmul.f32 %v3009_v63, %v1103_v7  ;;  %v948_v59 = vunpack.c.3.s8 %v764_v38 }
 0x1ab   :  { %v1598_v44 = vpack.c.bf16 %v1372_v9, %v1370_v39  ;;  %v1645_v8 = vpack.c.bf16 %v1467_v15, %v1465_v33  ;;  %v850_v60 = vunpack.c.2.s8 %v740_v20  ;;  %v852_v46 = vunpack.c.3.s8 %v740_v20 }
 0x1ac   :  { %2339 = vmatpush1.bf16.msra.mxu0 %v1591_v31  ;;  %2410 = vmatprep.subr.bf16.mxu1 %v1646_v41  ;;  %v1597_v23 = vpack.c.bf16 %v1371_v1, %v1369_v43  ;;  %v945_v4 = vunpack.c.2.s8 %v763_v37  ;;  %v947_v19 = vunpack.c.3.s8 %v763_v37  ;;  %v849_v16 = vunpack.c.2.s8 %v739_v42  ;;  %v768_v1 = vld [vmem:[#allocation14 + $0x158] sm:$0xff] }
 0x1ad   :  { %2340 = vmatprep.subr.bf16.mxu0 %v1594_v56  ;;  %2411 = vmatpush1.bf16.msra.mxu1 %v1645_v8  ;;  %v1202_v10 = vcvt.s32.f32 %v946_v3  ;;  %v1204_v5 = vcvt.s32.f32 %v948_v59  ;;  %v1106_v48 = vcvt.s32.f32 %v850_v60  ;;  %v851_v58 = vunpack.c.3.s8 %v739_v42 }
 0x1ae   :  { %v1108_v53 = vcvt.s32.f32 %v852_v46  ;;  %v1201_v54 = vcvt.s32.f32 %v945_v4  ;;  %v1203_v55 = vcvt.s32.f32 %v947_v19  ;;  %v1105_v52 = vcvt.s32.f32 %v849_v16  ;;  %v767_v19 = vld [vmem:[#allocation14 + $0x150] sm:$0xff] }
 0x1af   :  { %v1470_v11 = vmul.f32 %v3006_v62, %v1202_v10  ;;  %v1472_v13 = vmul.f32 %v3006_v62, %v1204_v5  ;;  %v1374_v45 = vmul.f32 %v3006_v62, %v1106_v48  ;;  %v1107_v31 = vcvt.s32.f32 %v851_v58 }
 0x1b0   :  { %2341 = vmatpush1.bf16.msra.mxu0 %v1593_v61  ;;  %v1376_v24 = vmul.f32 %v3006_v62, %v1108_v53  ;;  %v1469_v28 = vmul.f32 %v3009_v63, %v1201_v54  ;;  %v1471_v57 = vmul.f32 %v3009_v63, %v1203_v55  ;;  %v1373_v47 = vmul.f32 %v3009_v63, %v1105_v52 }
 0x1b1   :  { %2342 = vmatprep.subr.bf16.mxu0 %v1596_v51  ;;  %v1648_v56 = vpack.c.bf16 %v1472_v13, %v1470_v11  ;;  %v1375_v61 = vmul.f32 %v3009_v63, %v1107_v31  ;;  %v950_v38 = vunpack.c.0.s8 %v766_v2  ;;  %v952_v51 = vunpack.c.1.s8 %v766_v2 }
 0x1b2   :  { %v1647_v6 = vpack.c.bf16 %v1471_v57, %v1469_v28  ;;  %v854_v0 = vunpack.c.0.s8 %v3604_v32  ;;  %v856_v20 = vunpack.c.1.s8 %v3604_v32  ;;  %v949_v49 = vunpack.c.0.s8 %v765_v34 }
 0x1b3   :  { %2412 = vmatprep.subr.bf16.mxu1 %v1648_v56  ;;  %v1599_v37 = vpack.c.bf16 %v1375_v61, %v1373_v47  ;;  %v1206_v21 = vcvt.s32.f32 %v950_v38  ;;  %v1208_v30 = vcvt.s32.f32 %v952_v51  ;;  %v951_v18 = vunpack.c.1.s8 %v765_v34  ;;  %v770_v61 = vld [vmem:[#allocation14 + $0x168] sm:$0xff] }
 0x1b4   :  { %2343 = vmatpush1.bf16.msra.mxu0 %v1595_v27  ;;  %v1600_v27 = vpack.c.bf16 %v1376_v24, %v1374_v45  ;;  %2413 = vmatpush1.bf16.msra.mxu1 %v1647_v6  ;;  %v1110_v12 = vcvt.s32.f32 %v854_v0  ;;  %v1112_v42 = vcvt.s32.f32 %v856_v20  ;;  %v1205_v35 = vcvt.s32.f32 %v949_v49 }
 0x1b5   :  { %2344 = vmatprep.subr.bf16.mxu0 %v1598_v44  ;;  %v1474_v50 = vmul.f32 %v3006_v62, %v1206_v21  ;;  %v1476_v26 = vmul.f32 %v3006_v62, %v1208_v30  ;;  %v1207_v17 = vcvt.s32.f32 %v951_v18  ;;  %v954_v22 = vunpack.c.2.s8 %v766_v2  ;;  %v769_v30 = vld [vmem:[#allocation14 + $0x160] sm:$0xff] }
 0x1b6   :  { %v1378_v36 = vmul.f32 %v3006_v62, %v1110_v12  ;;  %v1380_v40 = vmul.f32 %v3006_v62, %v1112_v42  ;;  %v1473_v14 = vmul.f32 %v3009_v63, %v1205_v35  ;;  %v956_v39 = vunpack.c.3.s8 %v766_v2 }
 0x1b7   :  { %v1650_v29 = vpack.c.bf16 %v1476_v26, %v1474_v50  ;;  %v1475_v7 = vmul.f32 %v3009_v63, %v1207_v17  ;;  %v1210_v9 = vcvt.s32.f32 %v954_v22  ;;  %v953_v41 = vunpack.c.2.s8 %v765_v34 }
 0x1b8   :  { %2345 = vmatpush1.bf16.msra.mxu0 %v1597_v23  ;;  %v1602_v25 = vpack.c.bf16 %v1380_v40, %v1378_v36  ;;  %v1212_v15 = vcvt.s32.f32 %v956_v39  ;;  %v955_v43 = vunpack.c.3.s8 %v765_v34  ;;  %v958_v59 = vunpack.c.0.s8 %v768_v1 }
 0x1b9   :  { %2346 = vmatprep.subr.bf16.mxu0 %v1600_v27  ;;  %2414 = vmatprep.subr.bf16.mxu1 %v1650_v29  ;;  %v1649_v33 = vpack.c.bf16 %v1475_v7, %v1473_v14  ;;  %v1478_v44 = vmul.f32 %v3006_v62, %v1210_v9  ;;  %v1209_v23 = vcvt.s32.f32 %v953_v41  ;;  %v960_v16 = vunpack.c.1.s8 %v768_v1 }
 0x1ba   :  { %v1480_v8 = vmul.f32 %v3006_v62, %v1212_v15  ;;  %v1211_v3 = vcvt.s32.f32 %v955_v43  ;;  %v1214_v10 = vcvt.s32.f32 %v958_v59  ;;  %v957_v53 = vunpack.c.0.s8 %v767_v19 }
 0x1bb   :  { %2415 = vmatpush1.bf16.msra.mxu1 %v1649_v33  ;;  %v1477_v46 = vmul.f32 %v3009_v63, %v1209_v23  ;;  %v1216_v48 = vcvt.s32.f32 %v960_v16  ;;  %v959_v54 = vunpack.c.1.s8 %v767_v19  ;;  %v962_v45 = vunpack.c.2.s8 %v768_v1  ;;  %v772_v23 = vld [vmem:[#allocation14 + $0x178] sm:$0xff] }
 0x1bc   :  { %2347 = vmatpush1.bf16.msra.mxu0 %v1599_v37  ;;  %v1652_v60 = vpack.c.bf16 %v1480_v8, %v1478_v44  ;;  %v1479_v4 = vmul.f32 %v3009_v63, %v1211_v3  ;;  %v1482_v58 = vmul.f32 %v3006_v62, %v1214_v10  ;;  %v1213_v52 = vcvt.s32.f32 %v957_v53 }
 0x1bd   :  { %2357 = vmatprep.subr.bf16.mxu0 %v1602_v25  ;;  %v1484_v55 = vmul.f32 %v3006_v62, %v1216_v48  ;;  %v1215_v2 = vcvt.s32.f32 %v959_v54  ;;  %v964_v24 = vunpack.c.3.s8 %v768_v1  ;;  %v1218_v28 = vcvt.s32.f32 %v962_v45 }
 0x1be   :  { %2416 = vmatprep.subr.bf16.mxu1 %v1652_v60  ;;  %v1651_v5 = vpack.c.bf16 %v1479_v4, %v1477_v46  ;;  %v1481_v13 = vmul.f32 %v3009_v63, %v1213_v52  ;;  %v961_v34 = vunpack.c.2.s8 %v767_v19  ;;  %v963_v56 = vunpack.c.3.s8 %v767_v19  ;;  %v771_v46 = vld [vmem:[#allocation14 + $0x170] sm:$0xff] }
 0x1bf   :  { %v1654_v11 = vpack.c.bf16 %v1484_v55, %v1482_v58  ;;  %v1483_v31 = vmul.f32 %v3009_v63, %v1215_v2  ;;  %v1220_v47 = vcvt.s32.f32 %v964_v24  ;;  %v1486_v38 = vmul.f32 %v3006_v62, %v1218_v28 }
 0x1c0   :  { %2417 = vmatpush1.bf16.msra.mxu1 %v1651_v5  ;;  %v1217_v27 = vcvt.s32.f32 %v961_v34  ;;  %v1219_v6 = vcvt.s32.f32 %v963_v56  ;;  %v966_v0 = vunpack.c.0.s8 %v770_v61  ;;  %v968_v49 = vunpack.c.1.s8 %v770_v61 }
 0x1c1   :  { %2418 = vmatprep.subr.bf16.mxu1 %v1654_v11  ;;  %v1653_v57 = vpack.c.bf16 %v1483_v31, %v1481_v13  ;;  %v1488_v51 = vmul.f32 %v3006_v62, %v1220_v47  ;;  %v965_v26 = vunpack.c.0.s8 %v769_v30  ;;  %v967_v35 = vunpack.c.1.s8 %v769_v30 }
 0x1c2   :  { %v1485_v37 = vmul.f32 %v3009_v63, %v1217_v27  ;;  %v1487_v21 = vmul.f32 %v3009_v63, %v1219_v6  ;;  %v1222_v12 = vcvt.s32.f32 %v966_v0  ;;  %v1224_v18 = vcvt.s32.f32 %v968_v49 }
 0x1c3   :  { %v1656_v20 = vpack.c.bf16 %v1488_v51, %v1486_v38  ;;  %v1221_v40 = vcvt.s32.f32 %v965_v26  ;;  %v1223_v17 = vcvt.s32.f32 %v967_v35  ;;  %v970_v22 = vunpack.c.2.s8 %v770_v61  ;;  %v741_v26 = vld [vmem:[#allocation14 + $0x80] sm:$0xff]  ;;  %v744_v35 = vld [vmem:[#allocation14 + $0x98] sm:$0xff] }
 0x1c4   :  { %2419 = vmatpush1.bf16.msra.mxu1 %v1653_v57  ;;  %v1655_v42 = vpack.c.bf16 %v1487_v21, %v1485_v37  ;;  %v1490_v50 = vmul.f32 %v3006_v62, %v1222_v12  ;;  %v1492_v36 = vmul.f32 %v3006_v62, %v1224_v18  ;;  %v972_v7 = vunpack.c.3.s8 %v770_v61  ;;  %v3644_v61 = vld [vmem:[#allocation14 + $0x188] sm:$0xff] }
 0x1c5   :  { %2420 = vmatprep.subr.bf16.mxu1 %v1656_v20  ;;  %v1489_v14 = vmul.f32 %v3009_v63, %v1221_v40  ;;  %v1491_v25 = vmul.f32 %v3009_v63, %v1223_v17  ;;  %v1226_v39 = vcvt.s32.f32 %v970_v22  ;;  %v969_v15 = vunpack.c.2.s8 %v769_v30 }
 0x1c6   :  { %v1658_v29 = vpack.c.bf16 %v1492_v36, %v1490_v50  ;;  %v1228_v33 = vcvt.s32.f32 %v972_v7  ;;  %v971_v41 = vunpack.c.3.s8 %v769_v30  ;;  %v974_v19 = vunpack.c.0.s8 %v772_v23  ;;  %v743_v36 = vld [vmem:[#allocation14 + $0x90] sm:$0xff]  ;;  %v3658_v7 = vld [vmem:[%s4298_s6] sm:$0xff] }
 0x1c7   :  { %v1657_v9 = vpack.c.bf16 %v1491_v25, %v1489_v14  ;;  %v1494_v43 = vmul.f32 %v3006_v62, %v1226_v39  ;;  %v1225_v44 = vcvt.s32.f32 %v969_v15  ;;  %v976_v16 = vunpack.c.1.s8 %v772_v23 }
 0x1c8   :  { %2421 = vmatpush1.bf16.msra.mxu1 %v1655_v42  ;;  %v1496_v1 = vmul.f32 %v3006_v62, %v1228_v33  ;;  %v1227_v8 = vcvt.s32.f32 %v971_v41  ;;  %v973_v10 = vunpack.c.0.s8 %v771_v46  ;;  %v1230_v5 = vcvt.s32.f32 %v974_v19 }
 0x1c9   :  { %2422 = vmatprep.subr.bf16.mxu1 %v1658_v29  ;;  %v1493_v59 = vmul.f32 %v3009_v63, %v1225_v44  ;;  %v1232_v48 = vcvt.s32.f32 %v976_v16  ;;  %v975_v58 = vunpack.c.1.s8 %v771_v46  ;;  %v978_v45 = vunpack.c.2.s8 %v772_v23 }
 0x1ca   :  { %v1660_v3 = vpack.c.bf16 %v1496_v1, %v1494_v43  ;;  %v1495_v60 = vmul.f32 %v3009_v63, %v1227_v8  ;;  %v1229_v53 = vcvt.s32.f32 %v973_v10  ;;  %v1498_v54 = vmul.f32 %v3006_v62, %v1230_v5 }
 0x1cb   :  { %v1500_v55 = vmul.f32 %v3006_v62, %v1232_v48  ;;  %v1231_v52 = vcvt.s32.f32 %v975_v58  ;;  %v980_v31 = vunpack.c.3.s8 %v772_v23  ;;  %v1234_v28 = vcvt.s32.f32 %v978_v45  ;;  %v746_v58 = vld [vmem:[#allocation14 + $0xa8] sm:$0xff] }
 0x1cc   :  { %2423 = vmatpush1.bf16.msra.mxu1 %v1657_v9  ;;  %v1659_v4 = vpack.c.bf16 %v1495_v60, %v1493_v59  ;;  %v1497_v2 = vmul.f32 %v3009_v63, %v1229_v53  ;;  %v977_v47 = vunpack.c.2.s8 %v771_v46  ;;  %v979_v56 = vunpack.c.3.s8 %v771_v46  ;;  %v4437_v59 = vld [vmem:[#allocation22_spill] sm:$0xff] }
 0x1cd   :  { %2424 = vmatprep.subr.bf16.mxu1 %v1660_v3  ;;  %v1662_v11 = vpack.c.bf16 %v1500_v55, %v1498_v54  ;;  %v1499_v13 = vmul.f32 %v3009_v63, %v1231_v52  ;;  %v1236_v57 = vcvt.s32.f32 %v980_v31  ;;  %v1502_v34 = vmul.f32 %v3006_v62, %v1234_v28  ;;  %v4436_v3 = vld [vmem:[#allocation24_spill] sm:$0xff] }
 0x1ce   :  { %v1233_v51 = vcvt.s32.f32 %v977_v47  ;;  %v1235_v27 = vcvt.s32.f32 %v979_v56  ;;  %v982_v20 = vunpack.c.0.s8 %v3644_v61  ;;  %v984_v37 = vunpack.c.1.s8 %v3644_v61  ;;  %v745_v47 = vld [vmem:[#allocation14 + $0xa0] sm:$0xff] }
 0x1cf   :  { %v1661_v24 = vpack.c.bf16 %v1499_v13, %v1497_v2  ;;  %v1504_v38 = vmul.f32 %v3006_v62, %v1236_v57  ;;  %v853_v40 = vunpack.c.0.s8 %v741_v26  ;;  %v855_v17 = vunpack.c.1.s8 %v741_v26 }
 0x1d0   :  { %2425 = vmatpush1.bf16.msra.mxu1 %v1659_v4  ;;  %v1501_v0 = vmul.f32 %v3009_v63, %v1233_v51  ;;  %v1503_v21 = vmul.f32 %v3009_v63, %v1235_v27  ;;  %v1238_v30 = vcvt.s32.f32 %v982_v20  ;;  %v1240_v49 = vcvt.s32.f32 %v984_v37 }
 0x1d1   :  { %2426 = vmatprep.subr.bf16.mxu1 %v1662_v11  ;;  %v1664_v6 = vpack.c.bf16 %v1504_v38, %v1502_v34  ;;  %v858_v29 = vunpack.c.2.s8 %v3604_v32  ;;  %v860_v14 = vunpack.c.3.s8 %v3604_v32  ;;  %v857_v22 = vunpack.c.2.s8 %v741_v26 }
 0x1d2   :  { %v1663_v12 = vpack.c.bf16 %v1503_v21, %v1501_v0  ;;  %v1506_v42 = vmul.f32 %v3006_v62, %v1238_v30  ;;  %v1508_v18 = vmul.f32 %v3006_v62, %v1240_v49  ;;  %v859_v25 = vunpack.c.3.s8 %v741_v26 }
 0x1d3   :  { %v862_v39 = vunpack.c.0.s8 %v744_v35  ;;  %v864_v9 = vunpack.c.1.s8 %v744_v35  ;;  %v861_v33 = vunpack.c.0.s8 %v743_v36  ;;  %v863_v15 = vunpack.c.1.s8 %v743_v36 }
 0x1d4   :  { %2427 = vmatpush1.bf16.msra.mxu1 %v1661_v24  ;;  %v1666_v50 = vpack.c.bf16 %v1508_v18, %v1506_v42  ;;  %v866_v41 = vunpack.c.2.s8 %v744_v35  ;;  %v868_v43 = vunpack.c.3.s8 %v744_v35  ;;  %v1109_v1 = vcvt.s32.f32 %v853_v40 }
 0x1d5   :  { %2428 = vmatprep.subr.bf16.mxu1 %v1664_v6  ;;  %v1111_v44 = vcvt.s32.f32 %v855_v17  ;;  %v1114_v8 = vcvt.s32.f32 %v858_v29  ;;  %v1116_v23 = vcvt.s32.f32 %v860_v14  ;;  %v1951_v32 = vrot.slane %v3658_v7, %v4436_v3  ;;  %v3837_v14 = vld [vmem:[#allocation14 + $0x198] sm:$0xff] }
 0x1d6   :  { %v4438_v60 = vsub.s32 2, %v4437_v59  ;;  %v1113_v4 = vcvt.s32.f32 %v857_v22  ;;  %v1115_v19 = vcvt.s32.f32 %v859_v25  ;;  %v1118_v16 = vcvt.s32.f32 %v862_v39 }
 0x1d7   :  { %v1120_v10 = vcvt.s32.f32 %v864_v9  ;;  %v1117_v5 = vcvt.s32.f32 %v861_v33  ;;  %v1119_v48 = vcvt.s32.f32 %v863_v15  ;;  %v1122_v53 = vcvt.s32.f32 %v866_v41  ;;  %v748_v9 = vld [vmem:[#allocation14 + $0xb8] sm:$0xff]  ;;  %v747_v33 = vld [vmem:[#allocation14 + $0xb0] sm:$0xff] }
 0x1d8   :  { %2429 = vmatpush1.bf16.msra.mxu1 %v1663_v12  ;;  %v3665_v46 = vrot.slane %v3658_v7, %v4438_v60  ;;  %v1124_v54 = vcvt.s32.f32 %v868_v43  ;;  %v865_v55 = vunpack.c.2.s8 %v743_v36  ;;  %v867_v52 = vunpack.c.3.s8 %v743_v36  ;;  %v4440_v12 = vld [vmem:[#allocation23_spill] sm:$0xff] }
 0x1d9   :  { %2439 = vmatprep.subr.bf16.mxu1 %v1666_v50  ;;  %v3668_v2 = vmul.f32 %v3009_v63, %v1109_v1  ;;  %v3671_v11 = vmul.f32 %v3009_v63, %v1111_v44  ;;  %v3674_v13 = vmul.f32 %v3006_v62, %v1114_v8  ;;  %v3677_v45 = vmul.f32 %v3006_v62, %v1116_v23 }
 0x1da   :  { %4439 = vst [vmem:[#allocation25_spill] sm:$0xff] %v3665_v46  ;;  %v3680_v31 = vmul.f32 %v3009_v63, %v1113_v4  ;;  %v3683_v24 = vmul.f32 %v3009_v63, %v1115_v19  ;;  %v870_v28 = vunpack.c.0.s8 %v746_v58  ;;  %v872_v57 = vunpack.c.1.s8 %v746_v58 }
 0x1db   :  { %v3686_v34 = vmul.f32 %v3006_v62, %v1118_v16  ;;  %v3689_v56 = vmul.f32 %v3006_v62, %v1120_v10  ;;  %v3692_v38 = vmul.f32 %v3009_v63, %v1117_v5  ;;  %v3695_v51 = vmul.f32 %v3009_v63, %v1119_v48 }
 0x1dc   :  { %v3698_v27 = vmul.f32 %v3006_v62, %v1122_v53  ;;  %v3701_v6 = vmul.f32 %v3006_v62, %v1124_v54  ;;  %v1121_v0 = vcvt.s32.f32 %v865_v55  ;;  %v1123_v20 = vcvt.s32.f32 %v867_v52 }
 0x1dd   :  { %v869_v37 = vunpack.c.0.s8 %v745_v47  ;;  %v871_v21 = vunpack.c.1.s8 %v745_v47  ;;  %v874_v30 = vunpack.c.2.s8 %v746_v58  ;;  %v876_v49 = vunpack.c.3.s8 %v746_v58 }
 0x1de   :  { %v1955_v42 = vrot.slane %v3658_v7, %v4440_v12  ;;  %v4441_v18 = vsub.s32 3, %v4437_v59  ;;  %v1126_v26 = vcvt.s32.f32 %v870_v28  ;;  %v1128_v35 = vcvt.s32.f32 %v872_v57 }
 0x1df   :  { %v3723_v25 = vmul.f32 %v3009_v63, %v1121_v0  ;;  %v3726_v39 = vmul.f32 %v3009_v63, %v1123_v20  ;;  %v1125_v15 = vcvt.s32.f32 %v869_v37  ;;  %v1127_v41 = vcvt.s32.f32 %v871_v21  ;;  %v3750_v37 = vld [vmem:[#allocation14 + $0xc8] sm:$0xff] }
 0x1e0   :  { %v3708_v50 = vrot.slane %v3658_v7, %v4441_v18  ;;  %v1130_v43 = vcvt.s32.f32 %v874_v30  ;;  %v1132_v1 = vcvt.s32.f32 %v876_v49  ;;  %v3729_v44 = vmul.f32 %v3006_v62, %v1126_v26  ;;  %v3752_v26 = vld [vmem:[#allocation14 + $0x180] sm:$0xff] }
 0x1e1   :  { %v3732_v8 = vmul.f32 %v3006_v62, %v1128_v35  ;;  %v873_v23 = vunpack.c.2.s8 %v745_v47  ;;  %v875_v60 = vunpack.c.3.s8 %v745_v47  ;;  %v878_v4 = vunpack.c.0.s8 %v748_v9  ;;  %v749_v47 = vld [vmem:[#allocation14 + $0xc0] sm:$0xff] }
 0x1e2   :  { %v880_v19 = vunpack.c.1.s8 %v748_v9  ;;  %v877_v16 = vunpack.c.0.s8 %v747_v33  ;;  %v879_v10 = vunpack.c.1.s8 %v747_v33  ;;  %v882_v5 = vunpack.c.2.s8 %v748_v9 }
 0x1e3   :  { %v884_v48 = vunpack.c.3.s8 %v748_v9  ;;  %v881_v58 = vunpack.c.2.s8 %v747_v33  ;;  %v883_v53 = vunpack.c.3.s8 %v747_v33  ;;  %v3735_v54 = vmul.f32 %v3009_v63, %v1125_v15 }
 0x1e4   :  { %v3738_v55 = vmul.f32 %v3009_v63, %v1127_v41  ;;  %v3741_v52 = vmul.f32 %v3006_v62, %v1130_v43  ;;  %v3744_v28 = vmul.f32 %v3006_v62, %v1132_v1  ;;  %v1129_v0 = vcvt.s32.f32 %v873_v23 }
 0x1e5   :  { %v1131_v20 = vcvt.s32.f32 %v875_v60  ;;  %v1134_v21 = vcvt.s32.f32 %v878_v4  ;;  %v1136_v30 = vcvt.s32.f32 %v880_v19  ;;  %v1133_v49 = vcvt.s32.f32 %v877_v16 }
 0x1e6   :  { %v1135_v18 = vcvt.s32.f32 %v879_v10  ;;  %v1138_v35 = vcvt.s32.f32 %v882_v5  ;;  %v1140_v9 = vcvt.s32.f32 %v884_v48  ;;  %v1137_v33 = vcvt.s32.f32 %v881_v58 }
 0x1e7   :  { %v1139_v15 = vcvt.s32.f32 %v883_v53  ;;  %v4442_v1 = vsub.s32 4, %v4437_v59  ;;  %v886_v60 = vunpack.c.0.s8 %v3750_v37  ;;  %v3765_v4 = vmul.f32 %v3009_v63, %v1129_v0 }
 0x1e8   :  { %v3768_v19 = vmul.f32 %v3009_v63, %v1131_v20  ;;  %v888_v16 = vunpack.c.1.s8 %v3750_v37  ;;  %v981_v10 = vunpack.c.0.s8 %v3752_v26  ;;  %v3773_v5 = vmul.f32 %v3006_v62, %v1134_v21 }
 0x1e9   :  { %v3761_v23 = vrot.slane %v3658_v7, %v4442_v1  ;;  %v3776_v48 = vmul.f32 %v3006_v62, %v1136_v30  ;;  %v3779_v58 = vmul.f32 %v3009_v63, %v1133_v49  ;;  %v3782_v53 = vmul.f32 %v3009_v63, %v1135_v18 }
 0x1ea   :  { %v3785_v0 = vmul.f32 %v3006_v62, %v1138_v35  ;;  %v3788_v20 = vmul.f32 %v3006_v62, %v1140_v9  ;;  %v3791_v1 = vmul.f32 %v3009_v63, %v1137_v33  ;;  %v3794_v21 = vmul.f32 %v3009_v63, %v1139_v15 }
 0x1eb   :  { %v4447_v49 = vsub.s32 5, %v4437_v59  ;;  %v4448_v35 = vsub.s32 7, %v4437_v59  ;;  %v1142_v9 = vcvt.s32.f32 %v886_v60  ;;  %v983_v33 = vunpack.c.1.s8 %v3752_v26 }
 0x1ec   :  { %4443 = vst [vmem:[#allocation28_spill] sm:$0xff] %v3785_v0  ;;  %4444 = vst [vmem:[#allocation27_spill] sm:$0xff] %v3791_v1  ;;  %v1237_v29 = vcvt.s32.f32 %v981_v10  ;;  %v986_v36 = vunpack.c.2.s8 %v3644_v61 }
 0x1ed   :  { %4445 = vst [vmem:[#allocation30_spill] sm:$0xff] %v3794_v21  ;;  %v3801_v18 = vrot.slane %v3658_v7, %v4447_v49  ;;  %v3806_v41 = vrot.slane %v3658_v7, %v4448_v35  ;;  %v1144_v49 = vcvt.s32.f32 %v888_v16  ;;  %v988_v7 = vunpack.c.3.s8 %v3644_v61 }
 0x1ee   :  { %v990_v61 = vunpack.c.0.s8 %v3837_v14 }
 0x1ef   :  { %v3830_v10 = vmul.f32 %v3006_v62, %v1144_v49  ;;  %v1244_v1 = vcvt.s32.f32 %v988_v7 }
 0x22f   :  { %v2022_v30 = vpop.f32.mrb[0].mxu1  ;;  %v3796_v43 = vpop.f32.mrb[4].mxu0 }
 0x230   :  { %4446 = vst [vmem:[#allocation29_spill] sm:$0xff] %v3796_v43  ;;  %v2023_v15 = vadd.f32 %v2022_v30, %v1951_v32  ;;  %v2024_v57 = vpop.f32.mrb[1].mxu1  ;;  %v2065_v22 = vpop.f32.mrb[5].mxu0  ;;  %v891_v43 = vunpack.c.3.s8 %v749_v47 }
 0x231   :  { %v2025_v35 = vadd.f32 %v2024_v57, %v1955_v42  ;;  %v2066_v60 = vadd.f32 %v2065_v22, %v3708_v50  ;;  %v2026_v17 = vpop.f32.mrb[2].mxu1  ;;  %v2067_v40 = vpop.f32.mrb[6].mxu0  ;;  %v885_v42 = vunpack.c.0.s8 %v749_v47 }
 0x232   :  { %v2152_v30 = vmul.f32 0.2, %v2023_v15  ;;  %v2027_v3 = vpop.f32.mrb[3].mxu1  ;;  %v2068_v59 = vpop.f32.mrb[7].mxu0  ;;  %v3827_v40 = vmul.f32 %v3006_v62, %v1142_v9  ;;  %v1239_v17 = vcvt.s32.f32 %v983_v33  ;;  %v890_v9 = vunpack.c.2.s8 %v3750_v37 }
 0x233   :  { %v2153_v57 = vmul.f32 0.2, %v2025_v35  ;;  %v2155_v50 = vmul.f32 0.2, %v2066_v60  ;;  %v3833_v3 = vmul.f32 %v3009_v63, %v1237_v29  ;;  %v887_v59 = vunpack.c.1.s8 %v749_v47 }
 0x234   :  { %v2160_v22 = vmax.f32 %v2023_v15, %v2152_v30  ;;  %v1141_v12 = vcvt.s32.f32 %v885_v42  ;;  %v892_v33 = vunpack.c.3.s8 %v3750_v37  ;;  %v985_v15 = vunpack.c.2.s8 %v3752_v26 }
 0x235   :  { %v2161_v32 = vmax.f32 %v2025_v35, %v2153_v57  ;;  %v2163_v16 = vmax.f32 %v2066_v60, %v2155_v50  ;;  %v987_v29 = vunpack.c.3.s8 %v3752_v26  ;;  %v889_v30 = vunpack.c.2.s8 %v749_v47  ;;  %v3843_v35 = vld [vmem:[#allocation14 + $0xd8] sm:$0xff] }
 0x236   :  { %v2168_v60 = vpack.c.bf16 %v2160_v22, %v2160_v22  ;;  %v1143_v57 = vcvt.s32.f32 %v887_v59  ;;  %v992_v50 = vunpack.c.1.s8 %v3837_v14  ;;  %v3848_v46 = vmul.f32 %v3009_v63, %v1239_v17  ;;  %v3852_v22 = vld [vmem:[#allocation14 + $0x190] sm:$0xff] }
 0x237   :  { %v2169_v49 = vpack.c.bf16 %v2161_v32, %v2161_v32  ;;  %v2171_v42 = vpack.c.bf16 %v2163_v16, %v2163_v16  ;;  %v1242_v37 = vcvt.s32.f32 %v986_v36  ;;  %v1146_v32 = vcvt.s32.f32 %v890_v9 }
 0x238   :  { %v1148_v26 = vcvt.s32.f32 %v892_v33  ;;  %v894_v47 = vunpack.c.0.s8 %v3843_v35  ;;  %v896_v21 = vunpack.c.1.s8 %v3843_v35  ;;  %v4449_v59 = vpack.c.bf16 %v3671_v11, %v3668_v2 }
 0x239   :  { %2348 = vmatprep.mubr.bf16.mxu0 %v2169_v49  ;;  %v1241_v16 = vcvt.s32.f32 %v985_v15  ;;  %v1243_v49 = vcvt.s32.f32 %v987_v29  ;;  %v1145_v17 = vcvt.s32.f32 %v889_v30  ;;  %v1147_v0 = vcvt.s32.f32 %v891_v43 }
 0x23a   :  { %2349 = vmatmul.mubr.bf16.vlgmr.msra.gmra.mrb[12].mxu0 %v2168_v60  ;;  %v4450_v36 = vpack.c.bf16 %v3677_v45, %v3674_v13  ;;  %v3861_v7 = vmul.f32 %v3009_v63, %v1141_v12  ;;  %v3864_v9 = vmul.f32 %v3009_v63, %v1143_v57  ;;  %v1246_v33 = vcvt.s32.f32 %v990_v61  ;;  %v3874_v13 = vld [vmem:[#allocation14 + $0xd0] sm:$0xff] }
 0x23b   :  { %2358 = vmatpush1.bf16.msra.mxu0 %v4449_v59  ;;  %2389 = vmatprep.mubr.bf16.mxu0 %v2171_v42  ;;  %v1248_v60 = vcvt.s32.f32 %v992_v50  ;;  %v3867_v2 = vmul.f32 %v3006_v62, %v1242_v37  ;;  %v3870_v11 = vmul.f32 %v3006_v62, %v1244_v1  ;;  %v989_v43 = vunpack.c.0.s8 %v3852_v22 }
 0x23c   :  { %2359 = vmatprep.subr.bf16.mxu0 %v4450_v36  ;;  %v991_v15 = vunpack.c.1.s8 %v3852_v22  ;;  %v3877_v45 = vmul.f32 %v3006_v62, %v1146_v32  ;;  %v3880_v12 = vmul.f32 %v3006_v62, %v1148_v26  ;;  %v1150_v29 = vcvt.s32.f32 %v894_v47  ;;  %v3985_v26 = vld [vmem:[#allocation14 + $0xe0] sm:$0xff] }
 0x23d   :  { %v1152_v30 = vcvt.s32.f32 %v896_v21  ;;  %v4451_v57 = vpack.c.bf16 %v3683_v24, %v3680_v31  ;;  %v3886_v1 = vmul.f32 %v3009_v63, %v1241_v16  ;;  %v3889_v61 = vmul.f32 %v3009_v63, %v1243_v49 }
 0x23e   :  { %v3892_v50 = vmul.f32 %v3009_v63, %v1145_v17  ;;  %v3895_v42 = vmul.f32 %v3009_v63, %v1147_v0  ;;  %v4452_v37 = vpack.c.bf16 %v3689_v56, %v3686_v34  ;;  %v3901_v21 = vmul.f32 %v3006_v62, %v1246_v33 }
 0x23f   :  { %2360 = vmatpush1.bf16.msra.mxu0 %v4451_v57  ;;  %v3904_v31 = vmul.f32 %v3006_v62, %v1248_v60  ;;  %v893_v24 = vunpack.c.0.s8 %v3874_v13  ;;  %v895_v32 = vunpack.c.1.s8 %v3874_v13  ;;  %v1245_v47 = vcvt.s32.f32 %v989_v43 }
 0x240   :  { %2361 = vmatprep.subr.bf16.mxu0 %v4452_v37  ;;  %v1247_v59 = vcvt.s32.f32 %v991_v15  ;;  %v3913_v34 = vmul.f32 %v3006_v62, %v1150_v29  ;;  %v3916_v56 = vmul.f32 %v3006_v62, %v1152_v30  ;;  %v994_v16 = vunpack.c.2.s8 %v3837_v14  ;;  %v3938_v30 = vld [vmem:[#allocation14 + $0x1a8] sm:$0xff] }
 0x241   :  { %v996_v49 = vunpack.c.3.s8 %v3837_v14  ;;  %v4455_v17 = vpack.c.bf16 %v3695_v51, %v3692_v38  ;;  %v4456_v15 = vpack.c.bf16 %v3701_v6, %v3698_v27  ;;  %v1149_v14 = vcvt.s32.f32 %v893_v24  ;;  %v3948_v6 = vld [vmem:[#allocation14 + $0xe8] sm:$0xff]  ;;  %v3953_v38 = vld [vmem:[#allocation14 + $0x1a0] sm:$0xff] }
 0x242   :  { %4453 = vst [vmem:[#allocation32_spill] sm:$0xff] %v3913_v34  ;;  %4454 = vst [vmem:[#allocation31_spill] sm:$0xff] %v3916_v56  ;;  %v1151_v29 = vcvt.s32.f32 %v895_v32  ;;  %v3941_v57 = vmul.f32 %v3009_v63, %v1245_v47  ;;  %v3944_v37 = vmul.f32 %v3009_v63, %v1247_v59  ;;  %v900_v27 = vunpack.c.3.s8 %v3843_v35 }
 0x243   :  { %2362 = vmatpush1.bf16.msra.mxu0 %v4455_v17  ;;  %v898_v17 = vunpack.c.2.s8 %v3843_v35  ;;  %v1250_v51 = vcvt.s32.f32 %v994_v16  ;;  %v1252_v24 = vcvt.s32.f32 %v996_v49  ;;  %v993_v32 = vunpack.c.2.s8 %v3852_v22 }
 0x244   :  { %2363 = vmatprep.subr.bf16.mxu0 %v4456_v15  ;;  %v4457_v47 = vpack.c.bf16 %v3726_v39, %v3723_v25  ;;  %v995_v59 = vunpack.c.3.s8 %v3852_v22  ;;  %v897_v43 = vunpack.c.2.s8 %v3874_v13  ;;  %v899_v35 = vunpack.c.3.s8 %v3874_v13 }
 0x245   :  { %v998_v60 = vunpack.c.0.s8 %v3938_v30  ;;  %v4458_v16 = vpack.c.bf16 %v3732_v8, %v3729_v44  ;;  %v3966_v49 = vmul.f32 %v3009_v63, %v1149_v14  ;;  %v3969_v15 = vmul.f32 %v3009_v63, %v1151_v29 }
 0x246   :  { %v1000_v25 = vunpack.c.1.s8 %v3938_v30  ;;  %v902_v39 = vunpack.c.0.s8 %v3948_v6  ;;  %v1154_v22 = vcvt.s32.f32 %v898_v17  ;;  %v904_v13 = vunpack.c.1.s8 %v3948_v6 }
 0x247   :  { %2364 = vmatpush1.bf16.msra.mxu0 %v4457_v47  ;;  %v1156_v47 = vcvt.s32.f32 %v900_v27  ;;  %v997_v33 = vunpack.c.0.s8 %v3953_v38  ;;  %v3976_v36 = vmul.f32 %v3006_v62, %v1250_v51  ;;  %v3979_v44 = vmul.f32 %v3006_v62, %v1252_v24 }
 0x248   :  { %2365 = vmatprep.subr.bf16.mxu0 %v4458_v16  ;;  %v1249_v8 = vcvt.s32.f32 %v993_v32  ;;  %v999_v14 = vunpack.c.1.s8 %v3953_v38  ;;  %v4459_v29 = vpack.c.bf16 %v3738_v55, %v3735_v54  ;;  %v1251_v16 = vcvt.s32.f32 %v995_v59 }
 0x249   :  { %v1153_v17 = vcvt.s32.f32 %v897_v43  ;;  %v1155_v27 = vcvt.s32.f32 %v899_v35  ;;  %v1254_v0 = vcvt.s32.f32 %v998_v60  ;;  %v4460_v51 = vpack.c.bf16 %v3744_v28, %v3741_v52 }
 0x24a   :  { %v1256_v34 = vcvt.s32.f32 %v1000_v25  ;;  %v1158_v56 = vcvt.s32.f32 %v902_v39  ;;  %v3995_v54 = vmul.f32 %v3006_v62, %v1154_v22  ;;  %v3998_v55 = vmul.f32 %v3006_v62, %v1156_v47 }
 0x24b   :  { %2366 = vmatpush1.bf16.msra.mxu0 %v4459_v29  ;;  %v1160_v60 = vcvt.s32.f32 %v904_v13  ;;  %v1253_v43 = vcvt.s32.f32 %v997_v33  ;;  %v4003_v28 = vmul.f32 %v3009_v63, %v1249_v8  ;;  %v1255_v59 = vcvt.s32.f32 %v999_v14 }
 0x24c   :  { %2367 = vmatprep.subr.bf16.mxu0 %v4460_v51  ;;  %v901_v35 = vunpack.c.0.s8 %v3985_v26  ;;  %v4461_v39 = vpack.c.bf16 %v3768_v19, %v3765_v4  ;;  %v4012_v22 = vmul.f32 %v3009_v63, %v1251_v16  ;;  %v4015_v33 = vmul.f32 %v3009_v63, %v1153_v17 }
 0x24d   :  { %v4018_v47 = vmul.f32 %v3009_v63, %v1155_v27  ;;  %v4021_v13 = vmul.f32 %v3006_v62, %v1254_v0  ;;  %v4462_v4 = vpack.c.bf16 %v3776_v48, %v3773_v5  ;;  %v4028_v19 = vmul.f32 %v3006_v62, %v1256_v34 }
 0x24e   :  { %v4031_v16 = vmul.f32 %v3006_v62, %v1158_v56  ;;  %v903_v17 = vunpack.c.1.s8 %v3985_v26  ;;  %v4040_v5 = vmul.f32 %v3009_v63, %v1253_v43  ;;  %v4043_v56 = vmul.f32 %v3009_v63, %v1255_v59 }
 0x24f   :  { %2368 = vmatpush1.bf16.msra.mxu0 %v4461_v39  ;;  %v1157_v52 = vcvt.s32.f32 %v901_v35  ;;  %v1002_v32 = vunpack.c.2.s8 %v3938_v30  ;;  %v907_v35 = vunpack.c.3.s8 %v3985_v26 }
 0x250   :  { %v2104_v29 = vpop.f32.mrb[4].mxu1  ;;  %v4006_v25 = vpop.f32.mrb[8].mxu0  ;;  %2369 = vmatprep.subr.bf16.mxu0 %v4462_v4 }
 0x251   :  { %v2105_v8 = vadd.f32 %v2104_v29, %v3761_v23  ;;  %v2106_v14 = vpop.f32.mrb[5].mxu1  ;;  %v2147_v51 = vpop.f32.mrb[9].mxu0  ;;  %v4037_v29 = vmul.f32 %v3006_v62, %v1160_v60 }
 0x252   :  { %v2107_v27 = vadd.f32 %v2106_v14, %v3801_v18  ;;  %v2148_v0 = vadd.f32 %v2147_v51, %v3806_v41  ;;  %v2108_v39 = vpop.f32.mrb[6].mxu1  ;;  %v2149_v23 = vpop.f32.mrb[10].mxu0  ;;  %v4463_v41 = vpack.c.bf16 %v3782_v53, %v3779_v58 }
 0x253   :  { %v2156_v48 = vmul.f32 0.2, %v2105_v8  ;;  %v2109_v34 = vpop.f32.mrb[7].mxu1  ;;  %v2150_v4 = vpop.f32.mrb[11].mxu0  ;;  %v4464_v39 = vld [vmem:[#allocation28_spill] sm:$0xff]  ;;  %v4071_v23 = vld [vmem:[#allocation14 + $0xf8] sm:$0xff] }
 0x254   :  { %v2157_v18 = vmul.f32 0.2, %v2107_v27  ;;  %v2159_v14 = vmul.f32 0.2, %v2148_v0  ;;  %2370 = vmatpush1.bf16.msra.mxu0 %v4463_v41  ;;  %v4465_v59 = vpack.c.bf16 %v3788_v20, %v4464_v39  ;;  %v1159_v34 = vcvt.s32.f32 %v903_v17 }
 0x255   :  { %v2164_v51 = vmax.f32 %v2105_v8, %v2156_v48  ;;  %v1004_v4 = vunpack.c.3.s8 %v3938_v30  ;;  %v906_v41 = vunpack.c.2.s8 %v3948_v6  ;;  %v4067_v48 = vmul.f32 %v3009_v63, %v1157_v52 }
 0x256   :  { %2371 = vmatprep.subr.bf16.mxu0 %v4465_v59  ;;  %v2165_v58 = vmax.f32 %v2107_v27, %v2157_v18  ;;  %v2167_v8 = vmax.f32 %v2148_v0, %v2159_v14  ;;  %v1258_v39 = vcvt.s32.f32 %v1002_v32  ;;  %v4069_v59 = vld [vmem:[#allocation14 + $0x1b8] sm:$0xff]  ;;  %v4466_v27 = vld [vmem:[#allocation30_spill] sm:$0xff]  ;;  %v908_v30 = vunpack.c.3.s8 %v3948_v6 }
 0x257   :  { %v4467_v18 = vld [vmem:[#allocation27_spill] sm:$0xff]  ;;  %v1001_v0 = vunpack.c.2.s8 %v3953_v38  ;;  %v1003_v14 = vunpack.c.3.s8 %v3953_v38  ;;  %v2172_v20 = vpack.c.bf16 %v2164_v51, %v2164_v51  ;;  %v4469_v52 = vpack.c.bf16 %v3830_v10, %v3827_v40 }
 0x258   :  { %v2173_v17 = vpack.c.bf16 %v2165_v58, %v2165_v58  ;;  %v4468_v53 = vpack.c.bf16 %v4466_v27, %v4467_v18  ;;  %v4083_v32 = vmul.f32 %v3009_v63, %v1159_v34  ;;  %v905_v58 = vunpack.c.2.s8 %v3985_v26  ;;  %v4087_v27 = vld [vmem:[#allocation14 + $0x1b0] sm:$0xff] }
 0x259   :  { %v1006_v6 = vunpack.c.0.s8 %v4069_v59  ;;  %v910_v38 = vunpack.c.0.s8 %v4071_v23  ;;  %v912_v51 = vunpack.c.1.s8 %v4071_v23  ;;  %v2175_v40 = vpack.c.bf16 %v2167_v8, %v2167_v8  ;;  %v4103_v8 = vld [vmem:[#allocation14 + $0xf0] sm:$0xff] }
 0x25a   :  { %2372 = vmatpush1.bf16.msra.mxu0 %v4468_v53  ;;  %2430 = vmatprep.mubr.bf16.mxu1 %v2173_v17  ;;  %v1008_v53 = vunpack.c.1.s8 %v4069_v59  ;;  %v1260_v10 = vcvt.s32.f32 %v1004_v4  ;;  %v4094_v34 = vmul.f32 %v3006_v62, %v1258_v39  ;;  %v1162_v18 = vcvt.s32.f32 %v906_v41 }
 0x25b   :  { %2373 = vmatprep.subr.bf16.mxu0 %v4469_v52  ;;  %2431 = vmatmul.mubr.bf16.vlgmr.msra.gmra.mrb[8].mxu1 %v2172_v20  ;;  %v4470_v26 = vpack.c.bf16 %v3848_v46, %v3833_v3  ;;  %v4471_v17 = vpack.c.bf16 %v3864_v9, %v3861_v7  ;;  %v1164_v52 = vcvt.s32.f32 %v908_v30  ;;  %v1257_v43 = vcvt.s32.f32 %v1001_v0 }
 0x25c   :  { %v1259_v60 = vcvt.s32.f32 %v1003_v14  ;;  %v1005_v24 = vunpack.c.0.s8 %v4087_v27  ;;  %2471 = vmatprep.mubr.bf16.mxu1 %v2175_v40  ;;  %v4472_v4 = vpack.c.bf16 %v3870_v11, %v3867_v2  ;;  %v1625_v46 = vpack.c.bf16 %v4083_v32, %v4067_v48 }
 0x25d   :  { %2440 = vmatpush1.bf16.msra.mxu1 %v4470_v26  ;;  %v1161_v3 = vcvt.s32.f32 %v905_v58  ;;  %v1163_v41 = vcvt.s32.f32 %v907_v35  ;;  %v1007_v7 = vunpack.c.1.s8 %v4087_v27  ;;  %v4473_v9 = vpack.c.bf16 %v3880_v12, %v3877_v45 }
 0x25e   :  { %2374 = vmatpush1.bf16.msra.mxu0 %v4471_v17  ;;  %2441 = vmatprep.subr.bf16.mxu1 %v4472_v4  ;;  %v1262_v20 = vcvt.s32.f32 %v1006_v6  ;;  %v1264_v39 = vcvt.s32.f32 %v1008_v53  ;;  %v1166_v30 = vcvt.s32.f32 %v910_v38  ;;  %v1168_v0 = vcvt.s32.f32 %v912_v51 }
 0x25f   :  { %2375 = vmatprep.subr.bf16.mxu0 %v4473_v9  ;;  %v4115_v14 = vmul.f32 %v3006_v62, %v1260_v10  ;;  %v4118_v2 = vmul.f32 %v3006_v62, %v1162_v18  ;;  %v909_v11 = vunpack.c.0.s8 %v4103_v8  ;;  %v911_v35 = vunpack.c.1.s8 %v4103_v8 }
 0x260   :  { %v4474_v58 = vpack.c.bf16 %v3889_v61, %v3886_v1  ;;  %v4475_v45 = vpack.c.bf16 %v3895_v42, %v3892_v50  ;;  %v4129_v12 = vmul.f32 %v3006_v62, %v1164_v52  ;;  %v4132_v6 = vmul.f32 %v3009_v63, %v1257_v43  ;;  %v4477_v1 = vld [vmem:[#allocation31_spill] sm:$0xff]  ;;  %v4478_v61 = vld [vmem:[#allocation32_spill] sm:$0xff] }
 0x261   :  { %v4135_v53 = vmul.f32 %v3009_v63, %v1259_v60  ;;  %v1261_v38 = vcvt.s32.f32 %v1005_v24  ;;  %v4476_v51 = vpack.c.bf16 %v3904_v31, %v3901_v21  ;;  %v4479_v40 = vpack.c.bf16 %v4477_v1, %v4478_v61 }
 0x262   :  { %2442 = vmatpush1.bf16.msra.mxu1 %v4474_v58  ;;  %2376 = vmatpush1.bf16.msra.mxu0 %v4475_v45  ;;  %v4144_v50 = vmul.f32 %v3009_v63, %v1161_v3  ;;  %v4147_v42 = vmul.f32 %v3009_v63, %v1163_v41  ;;  %v1263_v43 = vcvt.s32.f32 %v1007_v7  ;;  %v1010_v10 = vunpack.c.2.s8 %v4069_v59 }
 0x263   :  { %2443 = vmatprep.subr.bf16.mxu1 %v4476_v51  ;;  %2377 = vmatprep.subr.bf16.mxu0 %v4479_v40  ;;  %v4151_v60 = vmul.f32 %v3006_v62, %v1262_v20  ;;  %v4154_v24 = vmul.f32 %v3006_v62, %v1264_v39  ;;  %v4157_v21 = vmul.f32 %v3006_v62, %v1166_v30  ;;  %v1165_v26 = vcvt.s32.f32 %v909_v11  ;;  %v782_v39 = vld [vmem:[#allocation14 + $0x1c8] sm:$0xff] }
 0x264   :  { %v4160_v31 = vmul.f32 %v3006_v62, %v1168_v0  ;;  %v1676_v18 = vpack.c.bf16 %v4115_v14, %v4094_v34  ;;  %v1167_v17 = vcvt.s32.f32 %v911_v35  ;;  %v1012_v52 = vunpack.c.3.s8 %v4069_v59 }
 0x265   :  { %v4480_v4 = vpack.c.bf16 %v3944_v37, %v3941_v57  ;;  %v4481_v3 = vpack.c.bf16 %v3969_v15, %v3966_v49  ;;  %v1628_v41 = vpack.c.bf16 %v4129_v12, %v4118_v2  ;;  %v1675_v7 = vpack.c.bf16 %v4135_v53, %v4132_v6  ;;  %v781_v2 = vld [vmem:[#allocation14 + $0x1c0] sm:$0xff] }
 0x266   :  { %v4176_v34 = vmul.f32 %v3009_v63, %v1261_v38  ;;  %v914_v9 = vunpack.c.2.s8 %v4071_v23  ;;  %v4482_v59 = vpack.c.bf16 %v3979_v44, %v3976_v36  ;;  %v4483_v57 = vpack.c.bf16 %v3998_v55, %v3995_v54 }
 0x267   :  { %2444 = vmatpush1.bf16.msra.mxu1 %v4480_v4  ;;  %2378 = vmatpush1.bf16.msra.mxu0 %v4481_v3  ;;  %v4186_v37 = vmul.f32 %v3009_v63, %v1263_v43  ;;  %v1266_v15 = vcvt.s32.f32 %v1010_v10  ;;  %v916_v49 = vunpack.c.3.s8 %v4071_v23  ;;  %v1009_v20 = vunpack.c.2.s8 %v4087_v27  ;;  %v4489_v10 = vld [vmem:[#allocation25_spill] sm:$0xff] }
 0x268   :  { %2445 = vmatprep.subr.bf16.mxu1 %v4482_v59  ;;  %2379 = vmatprep.subr.bf16.mxu0 %v4483_v57  ;;  %v1627_v30 = vpack.c.bf16 %v4147_v42, %v4144_v50  ;;  %v1678_v36 = vpack.c.bf16 %v4154_v24, %v4151_v60  ;;  %v1630_v44 = vpack.c.bf16 %v4160_v31, %v4157_v21  ;;  %v1011_v54 = vunpack.c.3.s8 %v4087_v27  ;;  %v4490_v60 = vld [vmem:[#allocation29_spill] sm:$0xff] }
 0x269   :  { %v4198_v55 = vmul.f32 %v3009_v63, %v1165_v26  ;;  %v4201_v0 = vmul.f32 %v3009_v63, %v1167_v17  ;;  %v1268_v23 = vcvt.s32.f32 %v1012_v52  ;;  %v913_v14 = vunpack.c.2.s8 %v4103_v8 }
 0x26a   :  { %v4484_v11 = vpack.c.bf16 %v4012_v22, %v4003_v28  ;;  %v4485_v35 = vpack.c.bf16 %v4018_v47, %v4015_v33  ;;  %v1170_v58 = vcvt.s32.f32 %v914_v9  ;;  %v915_v27 = vunpack.c.3.s8 %v4103_v8  ;;  %v783_v9 = vld [vmem:[#allocation14 + $0x1d0] sm:$0xff] }
 0x26b   :  { %v1014_v45 = vunpack.c.0.s8 %v782_v39  ;;  %v1016_v12 = vunpack.c.1.s8 %v782_v39  ;;  %v4486_v6 = vpack.c.bf16 %v4028_v19, %v4021_v13  ;;  %v4487_v53 = vpack.c.bf16 %v4037_v29, %v4031_v16 }
 0x26c   :  { %2446 = vmatpush1.bf16.msra.mxu1 %v4484_v11  ;;  %2380 = vmatpush1.bf16.msra.mxu0 %v4485_v35  ;;  %v1677_v28 = vpack.c.bf16 %v4186_v37, %v4176_v34  ;;  %v1534_v22 = vmul.f32 %v3006_v62, %v1266_v15  ;;  %v1172_v33 = vcvt.s32.f32 %v916_v49  ;;  %v1265_v47 = vcvt.s32.f32 %v1009_v20 }
 0x26d   :  { %2447 = vmatprep.subr.bf16.mxu1 %v4486_v6  ;;  %2381 = vmatprep.subr.bf16.mxu0 %v4487_v53  ;;  %v1267_v38 = vcvt.s32.f32 %v1011_v54  ;;  %v1013_v51 = vunpack.c.0.s8 %v781_v2  ;;  %v1015_v8 = vunpack.c.1.s8 %v781_v2  ;;  %v1018_v1 = vunpack.c.2.s8 %v782_v39 }
 0x26e   :  { %v1629_v61 = vpack.c.bf16 %v4201_v0, %v4198_v55  ;;  %v1536_v13 = vmul.f32 %v3006_v62, %v1268_v23  ;;  %v1169_v19 = vcvt.s32.f32 %v913_v14  ;;  %v1020_v40 = vunpack.c.3.s8 %v782_v39 }
 0x26f   :  { %v4488_v16 = vpack.c.bf16 %v4043_v56, %v4040_v5  ;;  %v1438_v29 = vmul.f32 %v3006_v62, %v1170_v58  ;;  %v1171_v50 = vcvt.s32.f32 %v915_v27  ;;  %v1270_v42 = vcvt.s32.f32 %v1014_v45  ;;  %v784_v5 = vld [vmem:[#allocation14 + $0x1d8] sm:$0xff]  ;;  %v786_v27 = vld [vmem:[#allocation14 + $0x1e8] sm:$0xff] }
 0x270   :  { %2382 = vmatpush1.bf16.msra.mxu0 %v1625_v46  ;;  %v1272_v43 = vcvt.s32.f32 %v1016_v12  ;;  %v2064_v24 = vadd.f32 %v4490_v60, %v4489_v10  ;;  %v1440_v21 = vmul.f32 %v3006_v62, %v1172_v33  ;;  %v1533_v31 = vmul.f32 %v3009_v63, %v1265_v47  ;;  %v785_v47 = vld [vmem:[#allocation14 + $0x1e0] sm:$0xff] }
 0x271   :  { %2448 = vmatpush1.bf16.msra.mxu1 %v4488_v16  ;;  %2383 = vmatprep.subr.bf16.mxu0 %v1628_v41  ;;  %v1535_v56 = vmul.f32 %v3009_v63, %v1267_v38  ;;  %v1269_v26 = vcvt.s32.f32 %v1013_v51  ;;  %v1271_v48 = vcvt.s32.f32 %v1015_v8  ;;  %v1274_v32 = vcvt.s32.f32 %v1018_v1 }
 0x272   :  { %2449 = vmatprep.subr.bf16.mxu1 %v1676_v18  ;;  %v1437_v46 = vmul.f32 %v3009_v63, %v1169_v19  ;;  %v1276_v17 = vcvt.s32.f32 %v1020_v40  ;;  %v1017_v52 = vunpack.c.2.s8 %v781_v2  ;;  %v1019_v4 = vunpack.c.3.s8 %v781_v2 }
 0x273   :  { %v1439_v18 = vmul.f32 %v3009_v63, %v1171_v50  ;;  %v1538_v3 = vmul.f32 %v3006_v62, %v1270_v42  ;;  %v1540_v41 = vmul.f32 %v3006_v62, %v1272_v43  ;;  %v1022_v34 = vunpack.c.0.s8 %v784_v5 }
 0x274   :  { %2384 = vmatpush1.bf16.msra.mxu0 %v1627_v30  ;;  %v2154_v59 = vmul.f32 0.2, %v2064_v24  ;;  %v1680_v57 = vpack.c.bf16 %v1536_v13, %v1534_v22  ;;  %v1632_v37 = vpack.c.bf16 %v1440_v21, %v1438_v29  ;;  %v1024_v15 = vunpack.c.1.s8 %v784_v5 }
 0x275   :  { %2450 = vmatpush1.bf16.msra.mxu1 %v1675_v7  ;;  %2385 = vmatprep.subr.bf16.mxu0 %v1630_v44  ;;  %v1679_v49 = vpack.c.bf16 %v1535_v56, %v1533_v31  ;;  %v1537_v20 = vmul.f32 %v3009_v63, %v1269_v26  ;;  %v1539_v7 = vmul.f32 %v3009_v63, %v1271_v48  ;;  %v1273_v54 = vcvt.s32.f32 %v1017_v52 }
 0x276   :  { %2451 = vmatprep.subr.bf16.mxu1 %v1678_v36  ;;  %v1542_v39 = vmul.f32 %v3006_v62, %v1274_v32  ;;  %v1544_v30 = vmul.f32 %v3006_v62, %v1276_v17  ;;  %v1275_v55 = vcvt.s32.f32 %v1019_v4  ;;  %v1021_v0 = vunpack.c.0.s8 %v783_v9 }
 0x277   :  { %v1631_v23 = vpack.c.bf16 %v1439_v18, %v1437_v46  ;;  %v1682_v36 = vpack.c.bf16 %v1540_v41, %v1538_v3  ;;  %v1278_v44 = vcvt.s32.f32 %v1022_v34  ;;  %v1023_v14 = vunpack.c.1.s8 %v783_v9 }
 0x278   :  { %2386 = vmatpush1.bf16.msra.mxu0 %v1629_v61  ;;  %v2162_v2 = vmax.f32 %v2064_v24, %v2154_v59  ;;  %v1280_v11 = vcvt.s32.f32 %v1024_v15  ;;  %v1026_v35 = vunpack.c.2.s8 %v784_v5  ;;  %v1028_v58 = vunpack.c.3.s8 %v784_v5  ;;  %v788_v5 = vld [vmem:[#allocation14 + $0x1f8] sm:$0xff] }
 0x279   :  { %2452 = vmatpush1.bf16.msra.mxu1 %v1677_v28  ;;  %2387 = vmatprep.subr.bf16.mxu0 %v1632_v37  ;;  %v1681_v45 = vpack.c.bf16 %v1539_v7, %v1537_v20  ;;  %v1025_v12 = vunpack.c.2.s8 %v783_v9  ;;  %v1027_v6 = vunpack.c.3.s8 %v783_v9  ;;  %v1684_v53 = vpack.c.bf16 %v1544_v30, %v1542_v39  ;;  %v787_v20 = vld [vmem:[#allocation14 + $0x1f0] sm:$0xff] }
 0x27a   :  { %2453 = vmatprep.subr.bf16.mxu1 %v1680_v57  ;;  %v1541_v22 = vmul.f32 %v3009_v63, %v1273_v54  ;;  %v1543_v28 = vmul.f32 %v3009_v63, %v1275_v55  ;;  %v1277_v33 = vcvt.s32.f32 %v1021_v0  ;;  %v1546_v38 = vmul.f32 %v3006_v62, %v1278_v44 }
 0x27b   :  { %v1279_v51 = vcvt.s32.f32 %v1023_v14  ;;  %v1030_v8 = vunpack.c.0.s8 %v786_v27  ;;  %v1032_v1 = vunpack.c.1.s8 %v786_v27  ;;  %v2170_v61 = vpack.c.bf16 %v2162_v2, %v2162_v2 }
 0x27c   :  { %2388 = vmatpush1.bf16.msra.mxu0 %v1631_v23  ;;  %v1548_v13 = vmul.f32 %v3006_v62, %v1280_v11  ;;  %v1282_v19 = vcvt.s32.f32 %v1026_v35  ;;  %v1284_v40 = vcvt.s32.f32 %v1028_v58  ;;  %v1281_v16 = vcvt.s32.f32 %v1025_v12 }
 0x27d   :  { %2454 = vmatpush1.bf16.msra.mxu1 %v1679_v49  ;;  %v1283_v29 = vcvt.s32.f32 %v1027_v6  ;;  %v1029_v50 = vunpack.c.0.s8 %v785_v47  ;;  %v1683_v42 = vpack.c.bf16 %v1543_v28, %v1541_v22  ;;  %v1545_v43 = vmul.f32 %v3009_v63, %v1277_v33 }
 0x27e   :  { %2455 = vmatprep.subr.bf16.mxu1 %v1682_v36  ;;  %v1031_v10 = vunpack.c.1.s8 %v785_v47  ;;  %v1547_v60 = vmul.f32 %v3009_v63, %v1279_v51  ;;  %v1286_v24 = vcvt.s32.f32 %v1030_v8  ;;  %v1288_v21 = vcvt.s32.f32 %v1032_v1 }
 0x27f   :  { %2390 = vmatmul.mubr.bf16.vlgmr.msra.gmra.mrb[12].mxu0 %v2170_v61  ;;  %v1034_v31 = vunpack.c.2.s8 %v786_v27  ;;  %v1686_v56 = vpack.c.bf16 %v1548_v13, %v1546_v38  ;;  %v1550_v26 = vmul.f32 %v3006_v62, %v1282_v19  ;;  %v1552_v48 = vmul.f32 %v3006_v62, %v1284_v40 }
 0x280   :  { %v1036_v32 = vunpack.c.3.s8 %v786_v27  ;;  %v1549_v46 = vmul.f32 %v3009_v63, %v1281_v16  ;;  %v1551_v17 = vmul.f32 %v3009_v63, %v1283_v29  ;;  %v1285_v52 = vcvt.s32.f32 %v1029_v50  ;;  %v2540_v27 = vld [vmem:[%s4298_s6] sm:$0xff] }
 0x281   :  { %2456 = vmatpush1.bf16.msra.mxu1 %v1681_v45  ;;  %v1287_v4 = vcvt.s32.f32 %v1031_v10  ;;  %v1033_v18 = vunpack.c.2.s8 %v785_v47  ;;  %v1035_v3 = vunpack.c.3.s8 %v785_v47  ;;  %v1038_v41 = vunpack.c.0.s8 %v788_v5  ;;  %v4491_v45 = vld [vmem:[#allocation22_spill] sm:$0xff] }
 0x282   :  { %2457 = vmatprep.subr.bf16.mxu1 %v1684_v53  ;;  %v1685_v34 = vpack.c.bf16 %v1547_v60, %v1545_v43  ;;  %v1554_v9 = vmul.f32 %v3006_v62, %v1286_v24  ;;  %v1556_v59 = vmul.f32 %v3006_v62, %v1288_v21  ;;  %v1290_v57 = vcvt.s32.f32 %v1034_v31 }
 0x283   :  { %v1688_v37 = vpack.c.bf16 %v1552_v48, %v1550_v26  ;;  %v1292_v15 = vcvt.s32.f32 %v1036_v32  ;;  %v1040_v49 = vunpack.c.1.s8 %v788_v5  ;;  %v1687_v7 = vpack.c.bf16 %v1551_v17, %v1549_v46 }
 0x284   :  { %v1553_v39 = vmul.f32 %v3009_v63, %v1285_v52  ;;  %v1555_v30 = vmul.f32 %v3009_v63, %v1287_v4  ;;  %v1289_v54 = vcvt.s32.f32 %v1033_v18  ;;  %v1291_v55 = vcvt.s32.f32 %v1035_v3  ;;  %v2304_v4 = vld [vmem:[%s4301_s9] sm:$0x3]  ;;  %v4494_v3 = vld [vmem:[#allocation23_spill] sm:$0xff] }
 0x285   :  { %2458 = vmatpush1.bf16.msra.mxu1 %v1683_v42  ;;  %v1294_v0 = vcvt.s32.f32 %v1038_v41  ;;  %v1690_v23 = vpack.c.bf16 %v1556_v59, %v1554_v9  ;;  %v1558_v36 = vmul.f32 %v3006_v62, %v1290_v57  ;;  %v1037_v44 = vunpack.c.0.s8 %v787_v20  ;;  %v4493_v18 = vld [vmem:[#allocation24_spill] sm:$0xff] }
 0x286   :  { %2459 = vmatprep.subr.bf16.mxu1 %v1686_v56  ;;  %v1039_v14 = vunpack.c.1.s8 %v787_v20  ;;  %v1560_v2 = vmul.f32 %v3006_v62, %v1292_v15  ;;  %v1296_v11 = vcvt.s32.f32 %v1040_v49  ;;  %v1042_v35 = vunpack.c.2.s8 %v788_v5 }
 0x287   :  { %v1044_v58 = vunpack.c.3.s8 %v788_v5  ;;  %v4492_v12 = vsub.s32 6, %v4491_v45  ;;  %v1689_v53 = vpack.c.bf16 %v1555_v30, %v1553_v39  ;;  %v1557_v22 = vmul.f32 %v3009_v63, %v1289_v54 }
 0x288   :  { %v1559_v28 = vmul.f32 %v3009_v63, %v1291_v55  ;;  %v1562_v33 = vmul.f32 %v3006_v62, %v1294_v0  ;;  %v1293_v47 = vcvt.s32.f32 %v1037_v44  ;;  %v1295_v38 = vcvt.s32.f32 %v1039_v14 }
 0x289   :  { %2460 = vmatpush1.bf16.msra.mxu1 %v1685_v34  ;;  %v1975_v6 = vrot.slane %v2540_v27, %v4492_v12  ;;  %v1041_v51 = vunpack.c.2.s8 %v787_v20  ;;  %v1043_v8 = vunpack.c.3.s8 %v787_v20  ;;  %v1692_v1 = vpack.c.bf16 %v1560_v2, %v1558_v36 }
 0x28a   :  { %2461 = vmatprep.subr.bf16.mxu1 %v1688_v37  ;;  %v1564_v61 = vmul.f32 %v3006_v62, %v1296_v11  ;;  %v1298_v13 = vcvt.s32.f32 %v1042_v35  ;;  %v1300_v19 = vcvt.s32.f32 %v1044_v58  ;;  %v1691_v40 = vpack.c.bf16 %v1559_v28, %v1557_v22 }
 0x28b   :  { %v1561_v16 = vmul.f32 %v3009_v63, %v1293_v47  ;;  %v1563_v29 = vmul.f32 %v3009_v63, %v1295_v38  ;;  %v1297_v50 = vcvt.s32.f32 %v1041_v51  ;;  %v1299_v42 = vcvt.s32.f32 %v1043_v8 }
 0x28c   :  { %v2146_v43 = vadd.f32 %v4006_v25, %v1975_v6  ;;  %v1694_v10 = vpack.c.bf16 %v1564_v61, %v1562_v33  ;;  %v1566_v60 = vmul.f32 %v3006_v62, %v1298_v13  ;;  %v1568_v24 = vmul.f32 %v3006_v62, %v1300_v19 }
 0x28d   :  { %2462 = vmatpush1.bf16.msra.mxu1 %v1687_v7  ;;  %v1693_v21 = vpack.c.bf16 %v1563_v29, %v1561_v16  ;;  %v1565_v31 = vmul.f32 %v3009_v63, %v1297_v50  ;;  %v1567_v5 = vmul.f32 %v3009_v63, %v1299_v42  ;;  %v2309_v63 = vrot.slane %v2304_v4, %v4493_v18 }
 0x28e   :  { %2463 = vmatprep.subr.bf16.mxu1 %v1690_v23  ;;  %v2158_v56 = vmul.f32 0.2, %v2146_v43  ;;  %v1696_v26 = vpack.c.bf16 %v1568_v24, %v1566_v60  ;;  %v2313_v41 = vrot.slane %v2304_v4, %v4494_v3 }
 0x28f   :  { %v1695_v48 = vpack.c.bf16 %v1567_v5, %v1565_v31 }
 0x290   :  { %v2166_v32 = vmax.f32 %v2146_v43, %v2158_v56 }
 0x291   :  { %2464 = vmatpush1.bf16.msra.mxu1 %v1689_v53 }
 0x292   :  { %2465 = vmatprep.subr.bf16.mxu1 %v1692_v1  ;;  %v2174_v25 = vpack.c.bf16 %v2166_v32, %v2166_v32 }
 0x295   :  { %2466 = vmatpush1.bf16.msra.mxu1 %v1691_v40 }
 0x296   :  { %2467 = vmatprep.subr.bf16.mxu1 %v1694_v10 }
 0x299   :  { %2468 = vmatpush1.bf16.msra.mxu1 %v1693_v21 }
 0x29a   :  { %2469 = vmatprep.subr.bf16.mxu1 %v1696_v26 }
 0x29d   :  { %2470 = vmatpush1.bf16.msra.mxu1 %v1695_v48 }
 0x2a0   :  { %2472 = vmatmul.mubr.bf16.vlgmr.msra.gmra.mrb[8].mxu1 %v2174_v25 }
 0x352   :  { %v2391_v46 = vpop.f32.mrb[12].mxu0 }
 0x353   :  { %v2393_v17 = vpop.f32.mrb[13].mxu0  ;;  %v2514_v34 = vadd.f32 %v2391_v46, %v2309_v63 }
 0x354   :  { %v2395_v52 = vpop.f32.mrb[14].mxu0  ;;  %v2516_v9 = vadd.f32 %v2393_v17, %v2313_v41 }
 0x355   :  { %v2396_v62 = vpop.f32.mrb[15].mxu0 }
 0x373   :  { %v2473_v59 = vpop.f32.mrb[8].mxu1 }
 0x374   :  { %v2515_v57 = vadd.f32 %v2514_v34, %v2473_v59  ;;  %v2475_v37 = vpop.f32.mrb[9].mxu1 }
 0x375   :  { %v2517_v15 = vadd.f32 %v2516_v9, %v2475_v37  ;;  %v2477_v49 = vpop.f32.mrb[10].mxu1 }
 0x376   :  { %2480 = vst [vmem:[#allocation16] sm:$0xff] %v2515_v57  ;;  %v2478_v20 = vpop.f32.mrb[11].mxu1 }
 0x377   :  { %2481 = vst [vmem:[#allocation16 + $0x8] sm:$0xff] %v2517_v15 }
 0x378   :  { %2684 = shalt.err (!%p2681_p10)
}
 0x379   :  { %s2685_s30 = scalar_lea.hbm %s4302_s10, 256 }
 0x37a   :  { %p2686_p11 = scmp.ne.s32.totalorder %s4302_s10, %s2685_s30  ;;  %p2689_p12 = scmp.lt.u32.totalorder %s2685_s30, %s4302_s10 }
 0x37c   :  { %p2691_p13 = pnand %p2689_p12, %p2686_p11 }
 0x37e   :  { %2694 = shalt.err (!%p2691_p13)
}
 0x37f   :  { %2491 = dma.vmem_to_hbm [thread:$0]  %s2489_s2, 256, %s4302_s10, [#allocation7]  }
 0x380   :  { %2703 = dma.done.wait [#allocation7], 256  }
 0x381   :  { %2704 = vsyncadd [#allocation7], 4294967040 }
 0x382   :  { %2495 = vsyncpa [#allocation6], 1 }
 0x383   :  { %2496 = vsyncpa [#allocation9], 1 }
 0x384   :  { %2497 = vsyncpa [#allocation12], 1 }
 0x385   :  { %2498 = vsyncpa [#allocation15], 1 }
 0x386   :  { %2499 = vsyncpa [#allocation7], 1 }

</bundles_post_ra>
